<compile_context>
chip_gen: v6e
topology: v6e:2x2x1
jax: 0.10.0
libtpu: 0.0.40
codegen_flags: <defaults>
</compile_context>

<pallas_src>
import functools

import jax
import jax.numpy as jnp
from jax import lax
from jax.experimental import pallas as pl
from jax.experimental.pallas import tpu as pltpu


# ---------------------------------------------------------------------------
# Phase 1: bulk (non-recurrent) input projection  xW = x @ Wx
# ---------------------------------------------------------------------------
def _input_proj_kernel(x_ref, wx_ref, o_ref):
    # x_ref: (ROW_BLK, D) bf16, wx_ref: (D, 4H) bf16, o_ref: (ROW_BLK, 4H) bf16
    o_ref[...] = jnp.dot(
        x_ref[...], wx_ref[...], preferred_element_type=jnp.float32
    ).astype(o_ref.dtype)


# ---------------------------------------------------------------------------
# Phase 2: sequential recurrence  gates = xW_t + h_{t-1} @ Wh
# ---------------------------------------------------------------------------
def _lstm_recurrent_kernel(xw_ref, h0_ref, c0_ref, wh_ref,
                           out_ref, cN_ref,
                           h_sc, c_sc, *, hidden_size, t_blk):
    blk = pl.program_id(0)
    H = hidden_size

    # Initialize the recurrent carry from (h0, c0) on the first time block.
    @pl.when(blk == 0)
    def _():
        h_sc[...] = h0_ref[...]
        c_sc[...] = c0_ref[...]

    wh = wh_ref[...]  # (H, 4H) bf16, resident for the whole block

    def step(i, carry):
        h_prev = h_sc[...]          # (B_pad, H) f32
        c_prev = c_sc[...]          # (B_pad, H) f32

        # Only the h-side matmul is on the sequential critical path; bf16
        # operands, f32 accumulation.  Gate elementwise math stays in f32.
        gates = xw_ref[i].astype(jnp.float32) + jnp.dot(
            h_prev.astype(jnp.bfloat16), wh,
            preferred_element_type=jnp.float32)

        f_t = jax.nn.sigmoid(gates[:, 0 * H:1 * H])
        i_t = jax.nn.sigmoid(gates[:, 1 * H:2 * H])
        g_t = jnp.tanh(gates[:, 2 * H:3 * H])
        o_t = jax.nn.sigmoid(gates[:, 3 * H:4 * H])

        c_new = f_t * c_prev + i_t * g_t
        h_new = o_t * jnp.tanh(c_new)

        h_sc[...] = h_new
        c_sc[...] = c_new
        out_ref[i] = h_new
        return carry

    lax.fori_loop(0, t_blk, step, 0, unroll=True)

    @pl.when(blk == pl.num_programs(0) - 1)
    def _():
        cN_ref[...] = c_sc[...]


def _pick_t_blk(T, max_blk=16):
    for cand in range(min(T, max_blk), 0, -1):
        if T % cand == 0:
            return cand
    return 1


def lstm_pallas(x, states, wx, wh, *, t_blk=None):
    """x: (B, T, D); states: ((1,B,H),(1,B,H)); wx: (D,4H); wh: (H,4H)."""
    h0, c0 = states
    B, T, D = x.shape
    H = h0.shape[-1]
    G = 4 * H

    if t_blk is None:
        t_blk = _pick_t_blk(T)
    assert T % t_blk == 0

    # Pad batch up to a multiple of 8 sublanes so every vreg / store is dense
    # (zero-padded rows stay exactly zero through the matmuls and are sliced
    # off at the end).
    B_pad = max(8, ((B + 7) // 8) * 8)
    pad = B_pad - B

    x_k = jnp.swapaxes(x, 0, 1)                       # (T, B, D) time-major
    if pad:
        x_k = jnp.pad(x_k, ((0, 0), (0, pad), (0, 0)))
        h0p = jnp.pad(h0[0], ((0, pad), (0, 0)))
        c0p = jnp.pad(c0[0], ((0, pad), (0, 0)))
    else:
        h0p, c0p = h0[0], c0[0]

    wx_b = wx.astype(jnp.bfloat16)
    wh_b = wh.astype(jnp.bfloat16)

    # ---- Phase 1: batched input projection over all T*B_pad rows ----
    rows = T * B_pad
    row_blk = t_blk * B_pad
    x_flat = x_k.reshape(rows, D).astype(jnp.bfloat16)

    xw_flat = pl.pallas_call(
        _input_proj_kernel,
        out_shape=jax.ShapeDtypeStruct((rows, G), jnp.bfloat16),
        grid_spec=pltpu.PrefetchScalarGridSpec(
            num_scalar_prefetch=0,
            grid=(rows // row_blk,),
            in_specs=[
                pl.BlockSpec((row_blk, D), lambda i: (i, 0)),   # x rows
                pl.BlockSpec((D, G), lambda i: (0, 0)),         # Wx (resident)
            ],
            out_specs=pl.BlockSpec((row_blk, G), lambda i: (i, 0)),
        ),
        compiler_params=pltpu.CompilerParams(
            dimension_semantics=("parallel",)),
    )(x_flat, wx_b)
    xw = xw_flat.reshape(T, B_pad, G)

    # ---- Phase 2: sequential recurrence over T-blocks ----
    kernel = functools.partial(_lstm_recurrent_kernel,
                               hidden_size=H, t_blk=t_blk)

    out_k, cN = pl.pallas_call(
        kernel,
        out_shape=(
            jax.ShapeDtypeStruct((T, B_pad, H), jnp.float32),
            jax.ShapeDtypeStruct((B_pad, H), jnp.float32),
        ),
        grid_spec=pltpu.PrefetchScalarGridSpec(
            num_scalar_prefetch=0,
            grid=(T // t_blk,),
            in_specs=[
                pl.BlockSpec((t_blk, B_pad, G), lambda t: (t, 0, 0)),  # xW
                pl.BlockSpec((B_pad, H), lambda t: (0, 0)),            # h0
                pl.BlockSpec((B_pad, H), lambda t: (0, 0)),            # c0
                pl.BlockSpec((H, G), lambda t: (0, 0)),                # Wh
            ],
            out_specs=[
                pl.BlockSpec((t_blk, B_pad, H), lambda t: (t, 0, 0)),  # out
                pl.BlockSpec((B_pad, H), lambda t: (0, 0)),            # c_N
            ],
            scratch_shapes=[
                pltpu.VMEM((B_pad, H), jnp.float32),                   # h carry
                pltpu.VMEM((B_pad, H), jnp.float32),                   # c carry
            ],
        ),
        compiler_params=pltpu.CompilerParams(
            dimension_semantics=("arbitrary",)),  # time recurrence is serial
    )(xw, h0p, c0p, wh_b)

    out = jnp.swapaxes(out_k[:, :B, :], 0, 1)   # (B, T, H) batch-first
    hN = out_k[T - 1, :B, :][None]              # (1, B, H) — last hidden state
    cN = cN[:B, :][None]                        # (1, B, H)
    return out, (hN, cN)


def lstm_ref(x, states, wx, wh):
    """Pure-JAX f32 reference mirroring the PyTorch loop."""
    h0, c0 = states
    H = h0.shape[-1]

    def step(carry, x_t):
        h, c = carry
        gates = x_t @ wx + h @ wh
        f = jax.nn.sigmoid(gates[:, 0 * H:1 * H])
        i = jax.nn.sigmoid(gates[:, 1 * H:2 * H])
        g = jnp.tanh(gates[:, 2 * H:3 * H])
        o = jax.nn.sigmoid(gates[:, 3 * H:4 * H])
        c = f * c + i * g
        h = o * jnp.tanh(c)
        return (h, c), h

    (hN, cN), outs = lax.scan(step, (h0[0], c0[0]), jnp.swapaxes(x, 0, 1))
    return jnp.swapaxes(outs, 0, 1), (hN[None], cN[None])


if __name__ == "__main__":
    B, T = 2, 8
    D_IN, H = 256, 512          # forced by the hard-coded Linear(768, 512)

    key = jax.random.PRNGKey(0)
    kx, kh0, kc0, kf, ki, kc, ko = jax.random.split(key, 7)

    x = jax.random.normal(kx, (B, T, D_IN), dtype=jnp.float32)
    h0 = jax.random.normal(kh0, (1, B, H), dtype=jnp.float32) * 0.1
    c0 = jax.random.normal(kc0, (1, B, H), dtype=jnp.float32) * 0.1

    # PyTorch nn.Linear(768, 512, bias=False) weights: shape (512, 768),
    # uniform(-1/sqrt(768), 1/sqrt(768)).  Gate order f, i, c, o (the project's
    # custom cell — NOT torch.nn.LSTMCell's i,f,g,o ordering).
    bound = 1.0 / jnp.sqrt(jnp.float32(D_IN + H))
    def mk_w(k):
        return jax.random.uniform(k, (H, D_IN + H), jnp.float32, -bound, bound)
    Wf, Wi, Wc, Wo = mk_w(kf), mk_w(ki), mk_w(kc), mk_w(ko)

    # Pack the transposed gate weights: cat([x, h]) @ W.T == x @ Wx + h @ Wh
    W_all = jnp.concatenate([Wf.T, Wi.T, Wc.T, Wo.T], axis=1)  # (768, 4H)
    wx = W_all[:D_IN, :]   # (256, 2048)
    wh = W_all[D_IN:, :]   # (512, 2048)

    out, (hN, cN) = lstm_pallas(x, (h0, c0), wx, wh)
    jax.block_until_ready(out)
    jax.block_until_ready(hN)
    jax.block_until_ready(cN)

    out_r, (hN_r, cN_r) = lstm_ref(x, (h0, c0), wx, wh)
    assert out.shape == (B, T, H) and hN.shape == (1, B, H) and cN.shape == (1, B, H)
    # Matmul operands (and the stored xW projection) are bf16 in the kernel
    # with f32 accumulation / f32 gate math and carry, so compare against the
    # pure-f32 reference with a relaxed tolerance.
    assert jnp.allclose(out, out_r, rtol=5e-2, atol=5e-2)
    assert jnp.allclose(hN, hN_r, rtol=5e-2, atol=5e-2)
    assert jnp.allclose(cN, cN_r, rtol=5e-2, atol=5e-2)

    print("KERNEL_OK")
</pallas_src>

<mosaic_0001>
module attributes {stable_mosaic.version = 11 : i64} {
  func.func @_input_proj_kernel(%arg0: i32, %arg1: memref<64x256xbf16, #tpu.memory_space<vmem>>, %arg2: memref<256x2048xbf16, #tpu.memory_space<vmem>>, %arg3: memref<64x2048xbf16, #tpu.memory_space<vmem>>) attributes {dimension_semantics = [#tpu.dimension_semantics<parallel>], iteration_bounds = array<i64: 1>, scalar_prefetch = 0 : i64, scratch_operands = 0 : i64, tpu.core_type = #tpu.core_type<tc>, window_params = [{transform_indices = @transform_0, window_bounds = array<i64: 64, 256>}, {pipeline_mode = #tpu.pipeline_mode<synchronous>, transform_indices = @transform_1, window_bounds = array<i64: 256, 2048>}, {transform_indices = @transform_2, window_bounds = array<i64: 64, 2048>}]} {
    %c0 = arith.constant 0 : index
    %c0_0 = arith.constant 0 : index
    %0 = vector.load %arg1[%c0, %c0_0] : memref<64x256xbf16, #tpu.memory_space<vmem>>, vector<64x256xbf16>
    %c0_1 = arith.constant 0 : index
    %c0_2 = arith.constant 0 : index
    %1 = vector.load %arg2[%c0_1, %c0_2] : memref<256x2048xbf16, #tpu.memory_space<vmem>>, vector<256x2048xbf16>
    %cst = arith.constant dense<0.000000e+00> : vector<64x2048xf32>
    %2 = tpu.matmul %0, %1, %cst {dimension_numbers = #tpu.dot_dimension_numbers<[1], [0], [0], [1], [0, 0, 1, 1], [], []>} : vector<64x256xbf16>, vector<256x2048xbf16>, vector<64x2048xf32> -> vector<64x2048xf32>
    %3 = arith.truncf %2 : vector<64x2048xf32> to vector<64x2048xbf16>
    %c0_3 = arith.constant 0 : index
    %c0_4 = arith.constant 0 : index
    %4 = vector.load %arg3[%c0_3, %c0_4] : memref<64x2048xbf16, #tpu.memory_space<vmem>>, vector<64x2048xbf16>
    tpu.vector_store %arg3[%c0_3, %c0_4], %3 {strides = array<i32>} : memref<64x2048xbf16, #tpu.memory_space<vmem>>, vector<64x2048xbf16>,
    return
  }
  func.func @transform_0(%arg0: i32) -> (i32, i32) {
    %c0_i32 = arith.constant 0 : i32
    %c0_i32_0 = arith.constant 0 : i32
    return %arg0, %c0_i32 : i32, i32
  }
  func.func @transform_1(%arg0: i32) -> (i32, i32) {
    %c0_i32 = arith.constant 0 : i32
    %c0_i32_0 = arith.constant 0 : i32
    %c0_i32_1 = arith.constant 0 : i32
    return %c0_i32, %c0_i32_0 : i32, i32
  }
  func.func @transform_2(%arg0: i32) -> (i32, i32) {
    %c0_i32 = arith.constant 0 : i32
    %c0_i32_0 = arith.constant 0 : i32
    return %arg0, %c0_i32 : i32, i32
  }
}

</mosaic_0001>

<bundles_post_ra>
// kernel: tpu_custom_call.1
= control target key start
LH: loop header
LB: loop body
LE: loop exit
PB: predicated region body
PF: predicated region fallthrough
CT: control target
= control target key end

     0   :  { %7 = vsyncpa [#allocation3], 0  ;;  %s3260_s0 = inlined_call_operand.hbm [shape: bf16[64,256], index: 0, kind: input, shape index: {}]   ;;  %s3261_s1 = inlined_call_operand.hbm [shape: bf16[256,2048], index: 1, kind: input, shape index: {}]   ;;  %s3262_s2 = inlined_call_operand.hbm [shape: bf16[64,2048], index: 2, kind: output, shape index: {}]  }
   0x1   :  { %8 = vsyncpa [#allocation6], 0 }
   0x2   :  { %9 = vsyncpa [#allocation4], 0  ;;  %s3159_s9 = smov [#allocation2]  }
   0x3   :  { %s15_s10 = sshll.u32 %s3159_s9, 4  ;;  %s16_s10 = int_to_ptr.vmem [resolvable:$true] %s15_s10 }
   0x4   :  { %s3101_s11 = scalar_lea.vmem %s16_s10, 1024  ;;  %p3106_p1 = scmp.lt.s32.totalorder %s16_s10, %s16_s10 }
   0x5   :  { %p3102_p0 = scmp.ne.s32.totalorder %s16_s10, %s3101_s11  ;;  %p3107_p2 = scmp.lt.s32.totalorder %s3101_s11, %s3101_s11 }
   0x7   :  { %p3108_p3 = por %p3107_p2, %p3106_p1 }
   0x9   :  { %p3109_p4 = pnand %p3108_p3, %p3102_p0 }
   0xb   :  { %3112 = shalt.err (!%p3109_p4)
}
   0xc   :  { %s3160_s12 = smov 128   ;;  %s3161_s13 = smov 8  }
   0xd   :  { %21 = dma.hbm_to_vmem [thread:$0]  %s3260_s0, 1024, %s16_s10, [#allocation3], %s3160_s12, %s3160_s12, %s3161_s13  }
   0xe   :  { %s3162_s16 = smov [#allocation5]  }
   0xf   :  { %s27_s17 = sshll.u32 %s3162_s16, 4  ;;  %s28_s17 = int_to_ptr.vmem [resolvable:$true] %s27_s17 }
  0x10   :  { %s3121_s18 = scalar_lea.vmem %s28_s17, 32768  ;;  %p3126_p6 = scmp.lt.s32.totalorder %s28_s17, %s28_s17 }
  0x11   :  { %p3122_p5 = scmp.ne.s32.totalorder %s28_s17, %s3121_s18  ;;  %p3127_p7 = scmp.lt.s32.totalorder %s3121_s18, %s3121_s18 }
  0x13   :  { %p3128_p8 = por %p3127_p7, %p3126_p6 }
  0x15   :  { %p3129_p9 = pnand %p3128_p8, %p3122_p5 }
  0x17   :  { %3132 = shalt.err (!%p3129_p9)
}
  0x18   :  { %s3163_s19 = smov 1024   ;;  %s3164_s20 = smov 64  }
  0x19   :  { %33 = dma.hbm_to_vmem [thread:$0]  %s3261_s1, 32768, %s28_s17, [#allocation6], %s3163_s19, %s3163_s19, %s3164_s20  }
  0x1a   :  { %3153 = dma.done.wait [#allocation3], 1024  }
  0x1b   :  { %3154 = vsyncadd [#allocation3], 4294966272 }
  0x1c   :  { %3155 = dma.done.wait [#allocation6], 32768  }
  0x1d   :  { %3156 = vsyncadd [#allocation6], 4294934528  ;;  %v160_v0 = vld [vmem:[#allocation5 + $0x380] sm:$0xff]  ;;  %v161_v2 = vld [vmem:[#allocation5 + $0x388] sm:$0xff]  ;;  %s3165_s0 = smov [#allocation7]  }
  0x1e   :  { %v168_v1 = vld [vmem:[#allocation5 + $0x3c0] sm:$0xff]  ;;  %v169_v4 = vld [vmem:[#allocation5 + $0x3c8] sm:$0xff]  ;;  %s2661_s1 = sshll.u32 %s3165_s0, 4  ;;  %s2662_s1 = int_to_ptr.vmem [resolvable:$true] %s2661_s1 }
  0x1f   :  { %v2795_v3 = vcombine.high %v160_v0, %v168_v1  ;;  %v2794_v5 = vcombine.low %v160_v0, %v168_v1  ;;  %v144_v6 = vld [vmem:[#allocation5 + $0x300] sm:$0xff]  ;;  %v2797_v8 = vcombine.high %v161_v2, %v169_v4  ;;  %v2796_v9 = vcombine.low %v161_v2, %v169_v4  ;;  %v145_v11 = vld [vmem:[#allocation5 + $0x308] sm:$0xff]  ;;  %s3133_s23 = scalar_lea.vmem %s2662_s1, 8192  ;;  %p3138_p11 = scmp.lt.s32.totalorder %s2662_s1, %s2662_s1 }
  0x20   :  { %v152_v7 = vld [vmem:[#allocation5 + $0x340] sm:$0xff]  ;;  %v153_v12 = vld [vmem:[#allocation5 + $0x348] sm:$0xff]  ;;  %p3134_p10 = scmp.ne.s32.totalorder %s2662_s1, %s3133_s23  ;;  %p3139_p12 = scmp.lt.s32.totalorder %s3133_s23, %s3133_s23 }
  0x21   :  { %v2779_v10 = vcombine.high %v144_v6, %v152_v7  ;;  %v128_v13 = vld [vmem:[#allocation5 + $0x280] sm:$0xff]  ;;  %1624 = vmatprep.subr.bf16.mxu0 %v2795_v3  ;;  %v2781_v14 = vcombine.high %v145_v11, %v153_v12  ;;  %v129_v16 = vld [vmem:[#allocation5 + $0x288] sm:$0xff]  ;;  %1697 = vmatprep.subr.bf16.mxu1 %v2797_v8  ;;  %v2778_v18 = vcombine.low %v144_v6, %v152_v7 }
  0x22   :  { %v136_v15 = vld [vmem:[#allocation5 + $0x2c0] sm:$0xff]  ;;  %v137_v17 = vld [vmem:[#allocation5 + $0x2c8] sm:$0xff]  ;;  %1625 = vmatpush1.bf16.msra.mxu0 %v2794_v5  ;;  %1698 = vmatpush1.bf16.msra.mxu1 %v2796_v9  ;;  %v2780_v19 = vcombine.low %v145_v11, %v153_v12  ;;  %p3140_p13 = por %p3139_p12, %p3138_p11 }
  0x23   :  { %1626 = vmatprep.subr.bf16.mxu0 %v2779_v10  ;;  %v2763_v20 = vcombine.high %v128_v13, %v136_v15  ;;  %1699 = vmatprep.subr.bf16.mxu1 %v2781_v14  ;;  %v2765_v21 = vcombine.high %v129_v16, %v137_v17  ;;  %v112_v22 = vld [vmem:[#allocation5 + $0x200] sm:$0xff]  ;;  %v113_v24 = vld [vmem:[#allocation5 + $0x208] sm:$0xff]  ;;  %v2762_v26 = vcombine.low %v128_v13, %v136_v15 }
  0x24   :  { %v120_v23 = vld [vmem:[#allocation5 + $0x240] sm:$0xff]  ;;  %v121_v25 = vld [vmem:[#allocation5 + $0x248] sm:$0xff]  ;;  %v2764_v27 = vcombine.low %v129_v16, %v137_v17  ;;  %p3141_p0 = pnand %p3140_p13, %p3134_p10 }
  0x25   :  { %v2747_v28 = vcombine.high %v112_v22, %v120_v23  ;;  %v2749_v29 = vcombine.high %v113_v24, %v121_v25  ;;  %v96_v30 = vld [vmem:[#allocation5 + $0x180] sm:$0xff]  ;;  %v97_v32 = vld [vmem:[#allocation5 + $0x188] sm:$0xff]  ;;  %v2746_v34 = vcombine.low %v112_v22, %v120_v23  ;;  %v2748_v35 = vcombine.low %v113_v24, %v121_v25 }
  0x26   :  { %1627 = vmatpush1.bf16.msra.mxu0 %v2778_v18  ;;  %1700 = vmatpush1.bf16.msra.mxu1 %v2780_v19  ;;  %v104_v31 = vld [vmem:[#allocation5 + $0x1c0] sm:$0xff]  ;;  %v105_v33 = vld [vmem:[#allocation5 + $0x1c8] sm:$0xff] }
  0x27   :  { %1628 = vmatprep.subr.bf16.mxu0 %v2763_v20  ;;  %1701 = vmatprep.subr.bf16.mxu1 %v2765_v21  ;;  %v2731_v36 = vcombine.high %v96_v30, %v104_v31  ;;  %v2733_v37 = vcombine.high %v97_v32, %v105_v33  ;;  %v80_v38 = vld [vmem:[#allocation5 + $0x100] sm:$0xff]  ;;  %v81_v40 = vld [vmem:[#allocation5 + $0x108] sm:$0xff]  ;;  %v2730_v42 = vcombine.low %v96_v30, %v104_v31 }
  0x28   :  { %v88_v39 = vld [vmem:[#allocation5 + $0x140] sm:$0xff]  ;;  %v89_v41 = vld [vmem:[#allocation5 + $0x148] sm:$0xff]  ;;  %v2732_v43 = vcombine.low %v97_v32, %v105_v33 }
  0x29   :  { %v2715_v44 = vcombine.high %v80_v38, %v88_v39  ;;  %v2717_v45 = vcombine.high %v81_v40, %v89_v41  ;;  %v64_v46 = vld [vmem:[#allocation5 + $0x80] sm:$0xff]  ;;  %v65_v48 = vld [vmem:[#allocation5 + $0x88] sm:$0xff]  ;;  %v2714_v50 = vcombine.low %v80_v38, %v88_v39  ;;  %v2716_v51 = vcombine.low %v81_v40, %v89_v41 }
  0x2a   :  { %1629 = vmatpush1.bf16.msra.mxu0 %v2762_v26  ;;  %1702 = vmatpush1.bf16.msra.mxu1 %v2764_v27  ;;  %v72_v47 = vld [vmem:[#allocation5 + $0xc0] sm:$0xff]  ;;  %v73_v49 = vld [vmem:[#allocation5 + $0xc8] sm:$0xff] }
  0x2b   :  { %1630 = vmatprep.subr.bf16.mxu0 %v2747_v28  ;;  %1703 = vmatprep.subr.bf16.mxu1 %v2749_v29  ;;  %v2699_v52 = vcombine.high %v64_v46, %v72_v47  ;;  %v2701_v53 = vcombine.high %v65_v48, %v73_v49  ;;  %v48_v54 = vld [vmem:[#allocation5] sm:$0xff]  ;;  %v49_v57 = vld [vmem:[#allocation5 + $0x8] sm:$0xff]  ;;  %v2698_v59 = vcombine.low %v64_v46, %v72_v47 }
  0x2c   :  { %v56_v55 = vld [vmem:[#allocation5 + $0x40] sm:$0xff]  ;;  %v57_v58 = vld [vmem:[#allocation5 + $0x48] sm:$0xff]  ;;  %v2700_v60 = vcombine.low %v65_v48, %v73_v49 }
  0x2d   :  { %v3190_v56 = vld [vmem:[#allocation2 + $0x4] ss:$8 sps:$4 sm:$0xff]   ;;  %v2683_v61 = vcombine.high %v48_v54, %v56_v55  ;;  %v2685_v62 = vcombine.high %v49_v57, %v57_v58  ;;  %v2682_v3 = vcombine.low %v48_v54, %v56_v55  ;;  %v2684_v4 = vcombine.low %v49_v57, %v57_v58 }
  0x2e   :  { %1631 = vmatpush1.bf16.msra.mxu0 %v2746_v34  ;;  %1704 = vmatpush1.bf16.msra.mxu1 %v2748_v35  ;;  %v288_v63 = vld [vmem:[#allocation5 + $0x780] sm:$0xff]  ;;  %v289_v1 = vld [vmem:[#allocation5 + $0x788] sm:$0xff] }
  0x2f   :  { %1632 = vmatprep.subr.bf16.mxu0 %v2731_v36  ;;  %1705 = vmatprep.subr.bf16.mxu1 %v2733_v37  ;;  %v296_v0 = vld [vmem:[#allocation5 + $0x7c0] sm:$0xff]  ;;  %v297_v2 = vld [vmem:[#allocation5 + $0x7c8] sm:$0xff] }
  0x30   :  { %1656 = vmatprep.mubr.bf16.mxu0 %v3190_v56  ;;  %1729 = vmatprep.mubr.bf16.mxu1 %v3190_v56  ;;  %v2923_v5 = vcombine.high %v288_v63, %v296_v0  ;;  %v2925_v6 = vcombine.high %v289_v1, %v297_v2  ;;  %v272_v7 = vld [vmem:[#allocation5 + $0x700] sm:$0xff]  ;;  %v273_v9 = vld [vmem:[#allocation5 + $0x708] sm:$0xff]  ;;  %v2922_v11 = vcombine.low %v288_v63, %v296_v0  ;;  %v162_v0 = vld [vmem:[#allocation5 + $0x390] sm:$0xff] }
  0x31   :  { %v280_v8 = vld [vmem:[#allocation5 + $0x740] sm:$0xff]  ;;  %v281_v10 = vld [vmem:[#allocation5 + $0x748] sm:$0xff]  ;;  %v2924_v12 = vcombine.low %v289_v1, %v297_v2  ;;  %v170_v1 = vld [vmem:[#allocation5 + $0x3d0] sm:$0xff] }
  0x32   :  { %1633 = vmatpush1.bf16.msra.mxu0 %v2730_v42  ;;  %1706 = vmatpush1.bf16.msra.mxu1 %v2732_v43  ;;  %v2907_v13 = vcombine.high %v272_v7, %v280_v8  ;;  %v2909_v14 = vcombine.high %v273_v9, %v281_v10  ;;  %v256_v15 = vld [vmem:[#allocation5 + $0x680] sm:$0xff]  ;;  %v257_v17 = vld [vmem:[#allocation5 + $0x688] sm:$0xff]  ;;  %v2906_v19 = vcombine.low %v272_v7, %v280_v8  ;;  %v163_v2 = vld [vmem:[#allocation5 + $0x398] sm:$0xff] }
  0x33   :  { %1634 = vmatprep.subr.bf16.mxu0 %v2715_v44  ;;  %1707 = vmatprep.subr.bf16.mxu1 %v2717_v45  ;;  %v264_v16 = vld [vmem:[#allocation5 + $0x6c0] sm:$0xff]  ;;  %v265_v18 = vld [vmem:[#allocation5 + $0x6c8] sm:$0xff]  ;;  %v2908_v20 = vcombine.low %v273_v9, %v281_v10  ;;  %v146_v8 = vld [vmem:[#allocation5 + $0x310] sm:$0xff] }
  0x34   :  { %v2891_v21 = vcombine.high %v256_v15, %v264_v16  ;;  %v2893_v22 = vcombine.high %v257_v17, %v265_v18  ;;  %v240_v23 = vld [vmem:[#allocation5 + $0x600] sm:$0xff]  ;;  %v241_v25 = vld [vmem:[#allocation5 + $0x608] sm:$0xff]  ;;  %v2890_v27 = vcombine.low %v256_v15, %v264_v16  ;;  %v2892_v28 = vcombine.low %v257_v17, %v265_v18  ;;  %v154_v9 = vld [vmem:[#allocation5 + $0x350] sm:$0xff] }
  0x35   :  { %v248_v24 = vld [vmem:[#allocation5 + $0x640] sm:$0xff]  ;;  %v249_v26 = vld [vmem:[#allocation5 + $0x648] sm:$0xff]  ;;  %v2783_v15 = vcombine.high %v146_v8, %v154_v9  ;;  %v130_v17 = vld [vmem:[#allocation5 + $0x290] sm:$0xff] }
  0x36   :  { %1635 = vmatpush1.bf16.msra.mxu0 %v2714_v50  ;;  %1708 = vmatpush1.bf16.msra.mxu1 %v2716_v51  ;;  %v2875_v29 = vcombine.high %v240_v23, %v248_v24  ;;  %v2877_v30 = vcombine.high %v241_v25, %v249_v26  ;;  %v224_v31 = vld [vmem:[#allocation5 + $0x580] sm:$0xff]  ;;  %v225_v33 = vld [vmem:[#allocation5 + $0x588] sm:$0xff]  ;;  %v2874_v35 = vcombine.low %v240_v23, %v248_v24  ;;  %v138_v18 = vld [vmem:[#allocation5 + $0x2d0] sm:$0xff] }
  0x37   :  { %1636 = vmatprep.subr.bf16.mxu0 %v2699_v52  ;;  %1709 = vmatprep.subr.bf16.mxu1 %v2701_v53  ;;  %v232_v32 = vld [vmem:[#allocation5 + $0x5c0] sm:$0xff]  ;;  %v233_v34 = vld [vmem:[#allocation5 + $0x5c8] sm:$0xff]  ;;  %v2876_v36 = vcombine.low %v241_v25, %v249_v26  ;;  %v2767_v24 = vcombine.high %v130_v17, %v138_v18  ;;  %v114_v26 = vld [vmem:[#allocation5 + $0x210] sm:$0xff] }
  0x38   :  { %v2859_v37 = vcombine.high %v224_v31, %v232_v32  ;;  %v2861_v38 = vcombine.high %v225_v33, %v233_v34  ;;  %v208_v39 = vld [vmem:[#allocation5 + $0x500] sm:$0xff]  ;;  %v209_v41 = vld [vmem:[#allocation5 + $0x508] sm:$0xff]  ;;  %v2858_v43 = vcombine.low %v224_v31, %v232_v32  ;;  %v2860_v44 = vcombine.low %v225_v33, %v233_v34 }
  0x39   :  { %v216_v40 = vld [vmem:[#allocation5 + $0x540] sm:$0xff]  ;;  %v217_v42 = vld [vmem:[#allocation5 + $0x548] sm:$0xff]  ;;  %v2766_v31 = vcombine.low %v130_v17, %v138_v18  ;;  %v274_v17 = vld [vmem:[#allocation5 + $0x710] sm:$0xff] }
  0x3a   :  { %1637 = vmatpush1.bf16.msra.mxu0 %v2698_v59  ;;  %1710 = vmatpush1.bf16.msra.mxu1 %v2700_v60  ;;  %v2843_v45 = vcombine.high %v208_v39, %v216_v40  ;;  %v2845_v46 = vcombine.high %v209_v41, %v217_v42  ;;  %v192_v47 = vld [vmem:[#allocation5 + $0x480] sm:$0xff]  ;;  %v193_v49 = vld [vmem:[#allocation5 + $0x488] sm:$0xff]  ;;  %v2842_v51 = vcombine.low %v208_v39, %v216_v40  ;;  %v107_v39 = vld [vmem:[#allocation5 + $0x1d8] sm:$0xff] }
  0x3b   :  { %1638 = vmatprep.subr.bf16.mxu0 %v2683_v61  ;;  %1711 = vmatprep.subr.bf16.mxu1 %v2685_v62  ;;  %v200_v48 = vld [vmem:[#allocation5 + $0x4c0] sm:$0xff]  ;;  %v201_v50 = vld [vmem:[#allocation5 + $0x4c8] sm:$0xff]  ;;  %v2844_v52 = vcombine.low %v209_v41, %v217_v42  ;;  %v282_v18 = vld [vmem:[#allocation5 + $0x750] sm:$0xff] }
  0x3c   :  { %v2827_v53 = vcombine.high %v192_v47, %v200_v48  ;;  %v2829_v54 = vcombine.high %v193_v49, %v201_v50  ;;  %v176_v55 = vld [vmem:[#allocation5 + $0x400] sm:$0xff]  ;;  %v177_v58 = vld [vmem:[#allocation5 + $0x408] sm:$0xff]  ;;  %v2826_v60 = vcombine.low %v192_v47, %v200_v48  ;;  %v2828_v61 = vcombine.low %v193_v49, %v201_v50  ;;  %v91_v47 = vld [vmem:[#allocation5 + $0x158] sm:$0xff] }
  0x3d   :  { %v184_v57 = vld [vmem:[#allocation5 + $0x440] sm:$0xff]  ;;  %v185_v59 = vld [vmem:[#allocation5 + $0x448] sm:$0xff] }
  0x3e   :  { %1639 = vmatpush1.bf16.msra.mxu0 %v2682_v3  ;;  %1712 = vmatpush1.bf16.msra.mxu1 %v2684_v4  ;;  %v2811_v62 = vcombine.high %v176_v55, %v184_v57  ;;  %v2813_v63 = vcombine.high %v177_v58, %v185_v59  ;;  %v171_v3 = vld [vmem:[#allocation5 + $0x3d8] sm:$0xff]  ;;  %v2810_v4 = vcombine.low %v176_v55, %v184_v57  ;;  %v3194_v10 = vld [vmem:[#allocation2] ss:$8 sps:$4 sm:$0xff]  }
  0x3f   :  { %1640 = vmatprep.subr.bf16.mxu0 %v2923_v5  ;;  %1713 = vmatprep.subr.bf16.mxu1 %v2925_v6  ;;  %v2812_v5 = vcombine.low %v177_v58, %v185_v59  ;;  %v2799_v6 = vcombine.high %v162_v0, %v170_v1  ;;  %v2801_v7 = vcombine.high %v163_v2, %v171_v3  ;;  %v3210_v48 = vld [vmem:[#allocation2 + $0x20] ss:$8 sps:$4 sm:$0xff]   ;;  %v3212_v55 = vld [vmem:[#allocation2 + $0x34] ss:$8 sps:$4 sm:$0xff]  }
  0x40   :  { %v67_v57 = vld [vmem:[#allocation5 + $0x98] sm:$0xff] }
  0x41   :  { %v75_v58 = vld [vmem:[#allocation5 + $0xd8] sm:$0xff] }
  0x42   :  { %1641 = vmatpush2.bf16.msra.mxu0 %v2922_v11  ;;  %1714 = vmatpush2.bf16.msra.mxu1 %v2924_v12  ;;  %v147_v11 = vld [vmem:[#allocation5 + $0x318] sm:$0xff] }
  0x43   :  { %1642 = vmatprep.subr.bf16.mxu0 %v2907_v13  ;;  %1715 = vmatprep.subr.bf16.mxu1 %v2909_v14  ;;  %v155_v12 = vld [vmem:[#allocation5 + $0x358] sm:$0xff]  ;;  %v2798_v13 = vcombine.low %v162_v0, %v170_v1  ;;  %v2800_v14 = vcombine.low %v163_v2, %v171_v3  ;;  %v58_v0 = vld [vmem:[#allocation5 + $0x50] sm:$0xff] }
  0x44   :  { %v2785_v16 = vcombine.high %v147_v11, %v155_v12  ;;  %v2784_v23 = vcombine.low %v147_v11, %v155_v12  ;;  %v51_v1 = vld [vmem:[#allocation5 + $0x18] sm:$0xff] }
  0x45   :  { %v59_v2 = vld [vmem:[#allocation5 + $0x58] sm:$0xff] }
  0x46   :  { %1643 = vmatpush2.bf16.msra.mxu0 %v2906_v19  ;;  %1716 = vmatpush2.bf16.msra.mxu1 %v2908_v20  ;;  %v3196_v19 = vld [vmem:[#allocation2 + $0x14] ss:$8 sps:$4 sm:$0xff]   ;;  %v3218_v3 = vld [vmem:[#allocation2 + $0x30] ss:$8 sps:$4 sm:$0xff]  }
  0x47   :  { %1644 = vmatprep.subr.bf16.mxu0 %v2891_v21  ;;  %1717 = vmatprep.subr.bf16.mxu1 %v2893_v22  ;;  %v131_v20 = vld [vmem:[#allocation5 + $0x298] sm:$0xff]  ;;  %v2782_v22 = vcombine.low %v146_v8, %v154_v9  ;;  %v290_v8 = vld [vmem:[#allocation5 + $0x790] sm:$0xff] }
  0x48   :  { %v139_v21 = vld [vmem:[#allocation5 + $0x2d8] sm:$0xff]  ;;  %v298_v9 = vld [vmem:[#allocation5 + $0x7d0] sm:$0xff] }
  0x49   :  { %v2769_v25 = vcombine.high %v131_v20, %v139_v21  ;;  %v2768_v32 = vcombine.low %v131_v20, %v139_v21  ;;  %v291_v11 = vld [vmem:[#allocation5 + $0x798] sm:$0xff] }
  0x4a   :  { %1645 = vmatpush2.bf16.msra.mxu0 %v2890_v27  ;;  %1718 = vmatpush2.bf16.msra.mxu1 %v2892_v28  ;;  %v122_v27 = vld [vmem:[#allocation5 + $0x250] sm:$0xff]  ;;  %v115_v28 = vld [vmem:[#allocation5 + $0x218] sm:$0xff] }
  0x4b   :  { %1646 = vmatprep.subr.bf16.mxu0 %v2875_v29  ;;  %1719 = vmatprep.subr.bf16.mxu1 %v2877_v30  ;;  %v123_v29 = vld [vmem:[#allocation5 + $0x258] sm:$0xff]  ;;  %v2751_v33 = vcombine.high %v114_v26, %v122_v27  ;;  %v2750_v40 = vcombine.low %v114_v26, %v122_v27  ;;  %v258_v26 = vld [vmem:[#allocation5 + $0x690] sm:$0xff] }
  0x4c   :  { %v3202_v30 = vld [vmem:[#allocation2 + $0x10] ss:$8 sps:$4 sm:$0xff]   ;;  %v2753_v34 = vcombine.high %v115_v28, %v123_v29  ;;  %v2752_v41 = vcombine.low %v115_v28, %v123_v29 }
  0x4d   :  { %v299_v12 = vld [vmem:[#allocation5 + $0x7d8] sm:$0xff]  ;;  %v266_v27 = vld [vmem:[#allocation5 + $0x6d0] sm:$0xff] }
  0x4e   :  { %1647 = vmatpush2.bf16.msra.mxu0 %v2874_v35  ;;  %1720 = vmatpush2.bf16.msra.mxu1 %v2876_v36  ;;  %v98_v35 = vld [vmem:[#allocation5 + $0x190] sm:$0xff]  ;;  %v275_v20 = vld [vmem:[#allocation5 + $0x718] sm:$0xff] }
  0x4f   :  { %1648 = vmatprep.subr.bf16.mxu0 %v2859_v37  ;;  %1721 = vmatprep.subr.bf16.mxu1 %v2861_v38  ;;  %v106_v36 = vld [vmem:[#allocation5 + $0x1d0] sm:$0xff]  ;;  %v3204_v37 = vld [vmem:[#allocation2 + $0x24] ss:$8 sps:$4 sm:$0xff]   ;;  %v99_v38 = vld [vmem:[#allocation5 + $0x198] sm:$0xff] }
  0x50   :  { %v2735_v42 = vcombine.high %v98_v35, %v106_v36  ;;  %v2734_v49 = vcombine.low %v98_v35, %v106_v36  ;;  %v2736_v50 = vcombine.low %v99_v38, %v107_v39  ;;  %v283_v21 = vld [vmem:[#allocation5 + $0x758] sm:$0xff]  ;;  %v242_v35 = vld [vmem:[#allocation5 + $0x610] sm:$0xff] }
  0x51   :  { %v259_v28 = vld [vmem:[#allocation5 + $0x698] sm:$0xff]  ;;  %v250_v36 = vld [vmem:[#allocation5 + $0x650] sm:$0xff] }
  0x52   :  { %1649 = vmatpush2.bf16.msra.mxu0 %v2858_v43  ;;  %1722 = vmatpush2.bf16.msra.mxu1 %v2860_v44  ;;  %v2737_v43 = vcombine.high %v99_v38, %v107_v39  ;;  %v82_v44 = vld [vmem:[#allocation5 + $0x110] sm:$0xff]  ;;  %v267_v29 = vld [vmem:[#allocation5 + $0x6d8] sm:$0xff] }
  0x53   :  { %1650 = vmatprep.subr.bf16.mxu0 %v2843_v45  ;;  %1723 = vmatprep.subr.bf16.mxu1 %v2845_v46  ;;  %v90_v45 = vld [vmem:[#allocation5 + $0x150] sm:$0xff]  ;;  %v83_v46 = vld [vmem:[#allocation5 + $0x118] sm:$0xff] }
  0x54   :  { %v2718_v59 = vcombine.low %v82_v44, %v90_v45  ;;  %v243_v38 = vld [vmem:[#allocation5 + $0x618] sm:$0xff] }
  0x55   :  { %v251_v39 = vld [vmem:[#allocation5 + $0x658] sm:$0xff] }
  0x56   :  { %1651 = vmatpush2.bf16.msra.mxu0 %v2842_v51  ;;  %1724 = vmatpush2.bf16.msra.mxu1 %v2844_v52  ;;  %v2719_v51 = vcombine.high %v82_v44, %v90_v45  ;;  %v2721_v52 = vcombine.high %v83_v46, %v91_v47  ;;  %v226_v44 = vld [vmem:[#allocation5 + $0x590] sm:$0xff] }
  0x57   :  { %1652 = vmatprep.subr.bf16.mxu0 %v2827_v53  ;;  %1725 = vmatprep.subr.bf16.mxu1 %v2829_v54  ;;  %v66_v53 = vld [vmem:[#allocation5 + $0x90] sm:$0xff] }
  0x58   :  { %v74_v54 = vld [vmem:[#allocation5 + $0xd0] sm:$0xff] }
  0x59   :  { %v234_v45 = vld [vmem:[#allocation5 + $0x5d0] sm:$0xff] }
  0x5a   :  { %1653 = vmatpush2.bf16.msra.mxu0 %v2826_v60  ;;  %1726 = vmatpush2.bf16.msra.mxu1 %v2828_v61  ;;  %v2720_v60 = vcombine.low %v83_v46, %v91_v47  ;;  %v2703_v61 = vcombine.high %v66_v53, %v74_v54  ;;  %v227_v46 = vld [vmem:[#allocation5 + $0x598] sm:$0xff] }
  0x5b   :  { %1654 = vmatprep.subr.bf16.mxu0 %v2811_v62  ;;  %1727 = vmatprep.subr.bf16.mxu1 %v2813_v63  ;;  %v2705_v62 = vcombine.high %v67_v57, %v75_v58  ;;  %v50_v63 = vld [vmem:[#allocation5 + $0x10] sm:$0xff]  ;;  %v235_v47 = vld [vmem:[#allocation5 + $0x5d8] sm:$0xff] }
  0x5e   :  { %1655 = vmatpush2.bf16.msra.mxu0 %v2810_v4  ;;  %1728 = vmatpush2.bf16.msra.mxu1 %v2812_v5  ;;  %v2702_v4 = vcombine.low %v66_v53, %v74_v54  ;;  %v2704_v5 = vcombine.low %v67_v57, %v75_v58  ;;  %v210_v53 = vld [vmem:[#allocation5 + $0x510] sm:$0xff]  ;;  %v211_v57 = vld [vmem:[#allocation5 + $0x518] sm:$0xff] }
  0x5f   :  { %1770 = vmatprep.subr.bf16.mxu0 %v2799_v6  ;;  %1843 = vmatprep.subr.bf16.mxu1 %v2801_v7  ;;  %v2687_v6 = vcombine.high %v50_v63, %v58_v0  ;;  %v2689_v7 = vcombine.high %v51_v1, %v59_v2  ;;  %v218_v54 = vld [vmem:[#allocation5 + $0x550] sm:$0xff]  ;;  %v219_v58 = vld [vmem:[#allocation5 + $0x558] sm:$0xff] }
  0x61   :  { %1657 = vmatmul.mubr.bf16.vlgmr.msra.gmra.mxu0 %v3194_v10  ;;  %1730 = vmatmul.mubr.bf16.vlgmr.msra.gmra.mxu1 %v3194_v10 }
  0x62   :  { %1771 = vmatpush1.bf16.msra.mxu0 %v2798_v13  ;;  %1844 = vmatpush1.bf16.msra.mxu1 %v2800_v14  ;;  %v2686_v13 = vcombine.low %v50_v63, %v58_v0  ;;  %v2688_v14 = vcombine.low %v51_v1, %v59_v2  ;;  %v194_v63 = vld [vmem:[#allocation5 + $0x490] sm:$0xff]  ;;  %v195_v1 = vld [vmem:[#allocation5 + $0x498] sm:$0xff] }
  0x63   :  { %1772 = vmatprep.subr.bf16.mxu0 %v2783_v15  ;;  %1845 = vmatprep.subr.bf16.mxu1 %v2785_v16  ;;  %v2927_v15 = vcombine.high %v290_v8, %v298_v9  ;;  %v2929_v16 = vcombine.high %v291_v11, %v299_v12  ;;  %v202_v0 = vld [vmem:[#allocation5 + $0x4d0] sm:$0xff]  ;;  %v203_v2 = vld [vmem:[#allocation5 + $0x4d8] sm:$0xff] }
  0x64   :  { %1666 = vmatprep.mubr.bf16.mxu0 %v3196_v19  ;;  %1739 = vmatprep.mubr.bf16.mxu1 %v3196_v19 }
  0x66   :  { %1773 = vmatpush1.bf16.msra.mxu0 %v2782_v22  ;;  %1846 = vmatpush1.bf16.msra.mxu1 %v2784_v23  ;;  %v2926_v22 = vcombine.low %v290_v8, %v298_v9  ;;  %v2928_v23 = vcombine.low %v291_v11, %v299_v12  ;;  %v178_v8 = vld [vmem:[#allocation5 + $0x410] sm:$0xff]  ;;  %v179_v11 = vld [vmem:[#allocation5 + $0x418] sm:$0xff] }
  0x67   :  { %1774 = vmatprep.subr.bf16.mxu0 %v2767_v24  ;;  %1847 = vmatprep.subr.bf16.mxu1 %v2769_v25  ;;  %v2911_v24 = vcombine.high %v274_v17, %v282_v18  ;;  %v2913_v25 = vcombine.high %v275_v20, %v283_v21  ;;  %v186_v9 = vld [vmem:[#allocation5 + $0x450] sm:$0xff]  ;;  %v187_v12 = vld [vmem:[#allocation5 + $0x458] sm:$0xff] }
  0x69   :  { %1667 = vmatmul.mubr.bf16.gmra.mxu0 %v3202_v30  ;;  %1740 = vmatmul.mubr.bf16.gmra.mxu1 %v3202_v30 }
  0x6a   :  { %1775 = vmatpush1.bf16.msra.mxu0 %v2766_v31  ;;  %1848 = vmatpush1.bf16.msra.mxu1 %v2768_v32  ;;  %v2910_v31 = vcombine.low %v274_v17, %v282_v18  ;;  %v2912_v32 = vcombine.low %v275_v20, %v283_v21  ;;  %v164_v17 = vld [vmem:[#allocation5 + $0x3a0] sm:$0xff]  ;;  %v165_v20 = vld [vmem:[#allocation5 + $0x3a8] sm:$0xff] }
  0x6b   :  { %1776 = vmatprep.subr.bf16.mxu0 %v2751_v33  ;;  %1849 = vmatprep.subr.bf16.mxu1 %v2753_v34  ;;  %v2895_v33 = vcombine.high %v258_v26, %v266_v27  ;;  %v2897_v34 = vcombine.high %v259_v28, %v267_v29  ;;  %v172_v18 = vld [vmem:[#allocation5 + $0x3e0] sm:$0xff]  ;;  %v173_v21 = vld [vmem:[#allocation5 + $0x3e8] sm:$0xff] }
  0x6c   :  { %1676 = vmatprep.mubr.bf16.mxu0 %v3204_v37  ;;  %1749 = vmatprep.mubr.bf16.mxu1 %v3204_v37 }
  0x6e   :  { %1777 = vmatpush1.bf16.msra.mxu0 %v2750_v40  ;;  %1850 = vmatpush1.bf16.msra.mxu1 %v2752_v41  ;;  %v2894_v40 = vcombine.low %v258_v26, %v266_v27  ;;  %v2896_v41 = vcombine.low %v259_v28, %v267_v29  ;;  %v148_v26 = vld [vmem:[#allocation5 + $0x320] sm:$0xff]  ;;  %v149_v28 = vld [vmem:[#allocation5 + $0x328] sm:$0xff] }
  0x6f   :  { %1778 = vmatprep.subr.bf16.mxu0 %v2735_v42  ;;  %1851 = vmatprep.subr.bf16.mxu1 %v2737_v43  ;;  %v2879_v42 = vcombine.high %v242_v35, %v250_v36  ;;  %v2881_v43 = vcombine.high %v243_v38, %v251_v39  ;;  %v156_v27 = vld [vmem:[#allocation5 + $0x360] sm:$0xff]  ;;  %v157_v29 = vld [vmem:[#allocation5 + $0x368] sm:$0xff] }
  0x71   :  { %1677 = vmatmul.mubr.bf16.gmra.mxu0 %v3210_v48  ;;  %1750 = vmatmul.mubr.bf16.gmra.mxu1 %v3210_v48 }
  0x72   :  { %1779 = vmatpush1.bf16.msra.mxu0 %v2734_v49  ;;  %1852 = vmatpush1.bf16.msra.mxu1 %v2736_v50  ;;  %v2878_v49 = vcombine.low %v242_v35, %v250_v36  ;;  %v2880_v50 = vcombine.low %v243_v38, %v251_v39  ;;  %v132_v35 = vld [vmem:[#allocation5 + $0x2a0] sm:$0xff]  ;;  %v133_v38 = vld [vmem:[#allocation5 + $0x2a8] sm:$0xff] }
  0x73   :  { %1780 = vmatprep.subr.bf16.mxu0 %v2719_v51  ;;  %1853 = vmatprep.subr.bf16.mxu1 %v2721_v52  ;;  %v2863_v51 = vcombine.high %v226_v44, %v234_v45  ;;  %v2865_v52 = vcombine.high %v227_v46, %v235_v47  ;;  %v140_v36 = vld [vmem:[#allocation5 + $0x2e0] sm:$0xff]  ;;  %v141_v39 = vld [vmem:[#allocation5 + $0x2e8] sm:$0xff] }
  0x74   :  { %1686 = vmatprep.mubr.bf16.mxu0 %v3212_v55  ;;  %1759 = vmatprep.mubr.bf16.mxu1 %v3212_v55 }
  0x76   :  { %1781 = vmatpush1.bf16.msra.mxu0 %v2718_v59  ;;  %1854 = vmatpush1.bf16.msra.mxu1 %v2720_v60  ;;  %v2862_v59 = vcombine.low %v226_v44, %v234_v45  ;;  %v2864_v60 = vcombine.low %v227_v46, %v235_v47  ;;  %v116_v44 = vld [vmem:[#allocation5 + $0x220] sm:$0xff]  ;;  %v117_v46 = vld [vmem:[#allocation5 + $0x228] sm:$0xff] }
  0x77   :  { %1782 = vmatprep.subr.bf16.mxu0 %v2703_v61  ;;  %1855 = vmatprep.subr.bf16.mxu1 %v2705_v62  ;;  %v2847_v61 = vcombine.high %v210_v53, %v218_v54  ;;  %v2849_v62 = vcombine.high %v211_v57, %v219_v58  ;;  %v124_v45 = vld [vmem:[#allocation5 + $0x260] sm:$0xff]  ;;  %v125_v47 = vld [vmem:[#allocation5 + $0x268] sm:$0xff] }
  0x79   :  { %1687 = vmatmul.mubr.bf16.gmra.mxu0 %v3218_v3  ;;  %1760 = vmatmul.mubr.bf16.gmra.mxu1 %v3218_v3 }
  0x7a   :  { %1783 = vmatpush1.bf16.msra.mxu0 %v2702_v4  ;;  %1856 = vmatpush1.bf16.msra.mxu1 %v2704_v5  ;;  %v2846_v4 = vcombine.low %v210_v53, %v218_v54  ;;  %v2848_v5 = vcombine.low %v211_v57, %v219_v58  ;;  %v100_v53 = vld [vmem:[#allocation5 + $0x1a0] sm:$0xff]  ;;  %v101_v57 = vld [vmem:[#allocation5 + $0x1a8] sm:$0xff] }
  0x7b   :  { %1784 = vmatprep.subr.bf16.mxu0 %v2687_v6  ;;  %1857 = vmatprep.subr.bf16.mxu1 %v2689_v7  ;;  %v2831_v6 = vcombine.high %v194_v63, %v202_v0  ;;  %v2833_v7 = vcombine.high %v195_v1, %v203_v2  ;;  %v108_v54 = vld [vmem:[#allocation5 + $0x1e0] sm:$0xff]  ;;  %v109_v58 = vld [vmem:[#allocation5 + $0x1e8] sm:$0xff] }
  0x7c   :  { %1802 = vmatprep.mubr.bf16.mxu0 %v3190_v56  ;;  %1875 = vmatprep.mubr.bf16.mxu1 %v3190_v56 }
  0x7e   :  { %1785 = vmatpush1.bf16.msra.mxu0 %v2686_v13  ;;  %1858 = vmatpush1.bf16.msra.mxu1 %v2688_v14  ;;  %v2830_v13 = vcombine.low %v194_v63, %v202_v0  ;;  %v2832_v14 = vcombine.low %v195_v1, %v203_v2  ;;  %v84_v63 = vld [vmem:[#allocation5 + $0x120] sm:$0xff]  ;;  %v85_v1 = vld [vmem:[#allocation5 + $0x128] sm:$0xff] }
  0x7f   :  { %1786 = vmatprep.subr.bf16.mxu0 %v2927_v15  ;;  %1859 = vmatprep.subr.bf16.mxu1 %v2929_v16  ;;  %v2815_v15 = vcombine.high %v178_v8, %v186_v9  ;;  %v2817_v16 = vcombine.high %v179_v11, %v187_v12  ;;  %v92_v0 = vld [vmem:[#allocation5 + $0x160] sm:$0xff]  ;;  %v93_v2 = vld [vmem:[#allocation5 + $0x168] sm:$0xff] }
  0x82   :  { %1787 = vmatpush2.bf16.msra.mxu0 %v2926_v22  ;;  %1860 = vmatpush2.bf16.msra.mxu1 %v2928_v23  ;;  %v2814_v22 = vcombine.low %v178_v8, %v186_v9  ;;  %v2816_v23 = vcombine.low %v179_v11, %v187_v12  ;;  %v68_v8 = vld [vmem:[#allocation5 + $0xa0] sm:$0xff]  ;;  %v69_v11 = vld [vmem:[#allocation5 + $0xa8] sm:$0xff] }
  0x83   :  { %1788 = vmatprep.subr.bf16.mxu0 %v2911_v24  ;;  %1861 = vmatprep.subr.bf16.mxu1 %v2913_v25  ;;  %v2803_v24 = vcombine.high %v164_v17, %v172_v18  ;;  %v2805_v25 = vcombine.high %v165_v20, %v173_v21  ;;  %v76_v9 = vld [vmem:[#allocation5 + $0xe0] sm:$0xff]  ;;  %v77_v12 = vld [vmem:[#allocation5 + $0xe8] sm:$0xff] }
  0x86   :  { %1789 = vmatpush2.bf16.msra.mxu0 %v2910_v31  ;;  %1862 = vmatpush2.bf16.msra.mxu1 %v2912_v32  ;;  %v2802_v31 = vcombine.low %v164_v17, %v172_v18  ;;  %v2804_v32 = vcombine.low %v165_v20, %v173_v21  ;;  %v52_v17 = vld [vmem:[#allocation5 + $0x20] sm:$0xff]  ;;  %v53_v20 = vld [vmem:[#allocation5 + $0x28] sm:$0xff] }
  0x87   :  { %1790 = vmatprep.subr.bf16.mxu0 %v2895_v33  ;;  %1863 = vmatprep.subr.bf16.mxu1 %v2897_v34  ;;  %v2787_v33 = vcombine.high %v148_v26, %v156_v27  ;;  %v2789_v34 = vcombine.high %v149_v28, %v157_v29  ;;  %v60_v18 = vld [vmem:[#allocation5 + $0x60] sm:$0xff]  ;;  %v61_v21 = vld [vmem:[#allocation5 + $0x68] sm:$0xff] }
  0x8a   :  { %1791 = vmatpush2.bf16.msra.mxu0 %v2894_v40  ;;  %1864 = vmatpush2.bf16.msra.mxu1 %v2896_v41  ;;  %v2786_v40 = vcombine.low %v148_v26, %v156_v27  ;;  %v2788_v41 = vcombine.low %v149_v28, %v157_v29  ;;  %v292_v26 = vld [vmem:[#allocation5 + $0x7a0] sm:$0xff]  ;;  %v293_v28 = vld [vmem:[#allocation5 + $0x7a8] sm:$0xff] }
  0x8b   :  { %1792 = vmatprep.subr.bf16.mxu0 %v2879_v42  ;;  %1865 = vmatprep.subr.bf16.mxu1 %v2881_v43  ;;  %v2771_v42 = vcombine.high %v132_v35, %v140_v36  ;;  %v2773_v43 = vcombine.high %v133_v38, %v141_v39  ;;  %v300_v27 = vld [vmem:[#allocation5 + $0x7e0] sm:$0xff]  ;;  %v301_v29 = vld [vmem:[#allocation5 + $0x7e8] sm:$0xff] }
  0x8e   :  { %1793 = vmatpush2.bf16.msra.mxu0 %v2878_v49  ;;  %1866 = vmatpush2.bf16.msra.mxu1 %v2880_v50  ;;  %v2770_v49 = vcombine.low %v132_v35, %v140_v36  ;;  %v2772_v50 = vcombine.low %v133_v38, %v141_v39  ;;  %v276_v35 = vld [vmem:[#allocation5 + $0x720] sm:$0xff]  ;;  %v277_v38 = vld [vmem:[#allocation5 + $0x728] sm:$0xff] }
  0x8f   :  { %1794 = vmatprep.subr.bf16.mxu0 %v2863_v51  ;;  %1867 = vmatprep.subr.bf16.mxu1 %v2865_v52  ;;  %v2755_v51 = vcombine.high %v116_v44, %v124_v45  ;;  %v2757_v52 = vcombine.high %v117_v46, %v125_v47  ;;  %v284_v36 = vld [vmem:[#allocation5 + $0x760] sm:$0xff]  ;;  %v285_v39 = vld [vmem:[#allocation5 + $0x768] sm:$0xff] }
  0x92   :  { %1795 = vmatpush2.bf16.msra.mxu0 %v2862_v59  ;;  %1868 = vmatpush2.bf16.msra.mxu1 %v2864_v60  ;;  %v2754_v59 = vcombine.low %v116_v44, %v124_v45  ;;  %v2756_v60 = vcombine.low %v117_v46, %v125_v47  ;;  %v260_v44 = vld [vmem:[#allocation5 + $0x6a0] sm:$0xff]  ;;  %v261_v46 = vld [vmem:[#allocation5 + $0x6a8] sm:$0xff] }
  0x93   :  { %1796 = vmatprep.subr.bf16.mxu0 %v2847_v61  ;;  %1869 = vmatprep.subr.bf16.mxu1 %v2849_v62  ;;  %v2739_v61 = vcombine.high %v100_v53, %v108_v54  ;;  %v2741_v62 = vcombine.high %v101_v57, %v109_v58  ;;  %v268_v45 = vld [vmem:[#allocation5 + $0x6e0] sm:$0xff]  ;;  %v269_v47 = vld [vmem:[#allocation5 + $0x6e8] sm:$0xff] }
  0x96   :  { %1797 = vmatpush2.bf16.msra.mxu0 %v2846_v4  ;;  %1870 = vmatpush2.bf16.msra.mxu1 %v2848_v5  ;;  %v2738_v4 = vcombine.low %v100_v53, %v108_v54  ;;  %v2740_v5 = vcombine.low %v101_v57, %v109_v58  ;;  %v252_v53 = vld [vmem:[#allocation5 + $0x660] sm:$0xff]  ;;  %v245_v54 = vld [vmem:[#allocation5 + $0x628] sm:$0xff]  ;;  %v2898_v58 = vcombine.low %v260_v44, %v268_v45 }
  0x97   :  { %1798 = vmatprep.subr.bf16.mxu0 %v2831_v6  ;;  %1871 = vmatprep.subr.bf16.mxu1 %v2833_v7  ;;  %v2723_v6 = vcombine.high %v84_v63, %v92_v0  ;;  %v2725_v7 = vcombine.high %v85_v1, %v93_v2  ;;  %v253_v57 = vld [vmem:[#allocation5 + $0x668] sm:$0xff] }
  0x9a   :  { %1799 = vmatpush2.bf16.msra.mxu0 %v2830_v13  ;;  %1872 = vmatpush2.bf16.msra.mxu1 %v2832_v14  ;;  %v2722_v13 = vcombine.low %v84_v63, %v92_v0  ;;  %v2724_v14 = vcombine.low %v85_v1, %v93_v2  ;;  %v236_v63 = vld [vmem:[#allocation5 + $0x5e0] sm:$0xff]  ;;  %v229_v0 = vld [vmem:[#allocation5 + $0x5a8] sm:$0xff] }
  0x9b   :  { %1800 = vmatprep.subr.bf16.mxu0 %v2815_v15  ;;  %1873 = vmatprep.subr.bf16.mxu1 %v2817_v16  ;;  %v2707_v15 = vcombine.high %v68_v8, %v76_v9  ;;  %v2709_v16 = vcombine.high %v69_v11, %v77_v12  ;;  %v237_v1 = vld [vmem:[#allocation5 + $0x5e8] sm:$0xff] }
  0x9e   :  { %1801 = vmatpush2.bf16.msra.mxu0 %v2814_v22  ;;  %1874 = vmatpush2.bf16.msra.mxu1 %v2816_v23  ;;  %v2706_v22 = vcombine.low %v68_v8, %v76_v9  ;;  %v2708_v23 = vcombine.low %v69_v11, %v77_v12  ;;  %v220_v8 = vld [vmem:[#allocation5 + $0x560] sm:$0xff]  ;;  %v213_v9 = vld [vmem:[#allocation5 + $0x528] sm:$0xff] }
  0x9f   :  { %1916 = vmatprep.subr.bf16.mxu0 %v2803_v24  ;;  %1989 = vmatprep.subr.bf16.mxu1 %v2805_v25  ;;  %v2691_v24 = vcombine.high %v52_v17, %v60_v18  ;;  %v2693_v25 = vcombine.high %v53_v20, %v61_v21  ;;  %v221_v11 = vld [vmem:[#allocation5 + $0x568] sm:$0xff] }
  0xa1   :  { %1803 = vmatmul.mubr.bf16.vlgmr.msra.gmra.mxu0 %v3194_v10  ;;  %1876 = vmatmul.mubr.bf16.vlgmr.msra.gmra.mxu1 %v3194_v10 }
  0xa2   :  { %1917 = vmatpush1.bf16.msra.mxu0 %v2802_v31  ;;  %1990 = vmatpush1.bf16.msra.mxu1 %v2804_v32  ;;  %v2690_v31 = vcombine.low %v52_v17, %v60_v18  ;;  %v2692_v32 = vcombine.low %v53_v20, %v61_v21  ;;  %v204_v17 = vld [vmem:[#allocation5 + $0x4e0] sm:$0xff]  ;;  %v197_v18 = vld [vmem:[#allocation5 + $0x4a8] sm:$0xff] }
  0xa3   :  { %1918 = vmatprep.subr.bf16.mxu0 %v2787_v33  ;;  %1991 = vmatprep.subr.bf16.mxu1 %v2789_v34  ;;  %v2931_v33 = vcombine.high %v292_v26, %v300_v27  ;;  %v2933_v34 = vcombine.high %v293_v28, %v301_v29  ;;  %v205_v20 = vld [vmem:[#allocation5 + $0x4e8] sm:$0xff] }
  0xa4   :  { %1812 = vmatprep.mubr.bf16.mxu0 %v3196_v19  ;;  %1885 = vmatprep.mubr.bf16.mxu1 %v3196_v19 }
  0xa6   :  { %1919 = vmatpush1.bf16.msra.mxu0 %v2786_v40  ;;  %1992 = vmatpush1.bf16.msra.mxu1 %v2788_v41  ;;  %v2930_v40 = vcombine.low %v292_v26, %v300_v27  ;;  %v2932_v41 = vcombine.low %v293_v28, %v301_v29  ;;  %v188_v26 = vld [vmem:[#allocation5 + $0x460] sm:$0xff]  ;;  %v181_v27 = vld [vmem:[#allocation5 + $0x428] sm:$0xff] }
  0xa7   :  { %1920 = vmatprep.subr.bf16.mxu0 %v2771_v42  ;;  %1993 = vmatprep.subr.bf16.mxu1 %v2773_v43  ;;  %v2915_v42 = vcombine.high %v276_v35, %v284_v36  ;;  %v2917_v43 = vcombine.high %v277_v38, %v285_v39  ;;  %v189_v28 = vld [vmem:[#allocation5 + $0x468] sm:$0xff] }
  0xa9   :  { %1813 = vmatmul.mubr.bf16.gmra.mxu0 %v3202_v30  ;;  %1886 = vmatmul.mubr.bf16.gmra.mxu1 %v3202_v30 }
  0xaa   :  { %1921 = vmatpush1.bf16.msra.mxu0 %v2770_v49  ;;  %1994 = vmatpush1.bf16.msra.mxu1 %v2772_v50  ;;  %v2914_v49 = vcombine.low %v276_v35, %v284_v36  ;;  %v2916_v50 = vcombine.low %v277_v38, %v285_v39  ;;  %v174_v35 = vld [vmem:[#allocation5 + $0x3f0] sm:$0xff]  ;;  %v167_v36 = vld [vmem:[#allocation5 + $0x3b8] sm:$0xff] }
  0xab   :  { %1922 = vmatprep.subr.bf16.mxu0 %v2755_v51  ;;  %1995 = vmatprep.subr.bf16.mxu1 %v2757_v52  ;;  %v2899_v51 = vcombine.high %v260_v44, %v268_v45  ;;  %v244_v52 = vld [vmem:[#allocation5 + $0x620] sm:$0xff]  ;;  %v175_v38 = vld [vmem:[#allocation5 + $0x3f8] sm:$0xff]  ;;  %v158_v44 = vld [vmem:[#allocation5 + $0x370] sm:$0xff] }
  0xac   :  { %1822 = vmatprep.mubr.bf16.mxu0 %v3204_v37  ;;  %1895 = vmatprep.mubr.bf16.mxu1 %v3204_v37  ;;  %v2882_v2 = vcombine.low %v244_v52, %v252_v53  ;;  %v151_v45 = vld [vmem:[#allocation5 + $0x338] sm:$0xff] }
  0xae   :  { %1923 = vmatpush1.bf16.msra.mxu0 %v2754_v59  ;;  %1996 = vmatpush1.bf16.msra.mxu1 %v2756_v60  ;;  %v2900_v59 = vcombine.low %v261_v46, %v269_v47  ;;  %v2883_v60 = vcombine.high %v244_v52, %v252_v53  ;;  %v142_v52 = vld [vmem:[#allocation5 + $0x2f0] sm:$0xff]  ;;  %v135_v53 = vld [vmem:[#allocation5 + $0x2b8] sm:$0xff] }
  0xaf   :  { %1924 = vmatprep.subr.bf16.mxu0 %v2739_v61  ;;  %1997 = vmatprep.subr.bf16.mxu1 %v2741_v62  ;;  %v2885_v61 = vcombine.high %v245_v54, %v253_v57  ;;  %v228_v62 = vld [vmem:[#allocation5 + $0x5a0] sm:$0xff] }
  0xb0   :  { %v2866_v12 = vcombine.low %v228_v62, %v236_v63 }
  0xb1   :  { %1823 = vmatmul.mubr.bf16.gmra.mxu0 %v3210_v48  ;;  %1896 = vmatmul.mubr.bf16.gmra.mxu1 %v3210_v48 }
  0xb2   :  { %1925 = vmatpush1.bf16.msra.mxu0 %v2738_v4  ;;  %1998 = vmatpush1.bf16.msra.mxu1 %v2740_v5  ;;  %v2884_v4 = vcombine.low %v245_v54, %v253_v57  ;;  %v2867_v5 = vcombine.high %v228_v62, %v236_v63  ;;  %v143_v54 = vld [vmem:[#allocation5 + $0x2f8] sm:$0xff]  ;;  %v126_v62 = vld [vmem:[#allocation5 + $0x270] sm:$0xff] }
  0xb3   :  { %1926 = vmatprep.subr.bf16.mxu0 %v2723_v6  ;;  %1999 = vmatprep.subr.bf16.mxu1 %v2725_v7  ;;  %v2869_v6 = vcombine.high %v229_v0, %v237_v1  ;;  %v212_v7 = vld [vmem:[#allocation5 + $0x520] sm:$0xff]  ;;  %v119_v63 = vld [vmem:[#allocation5 + $0x238] sm:$0xff] }
  0xb4   :  { %1832 = vmatprep.mubr.bf16.mxu0 %v3212_v55  ;;  %1905 = vmatprep.mubr.bf16.mxu1 %v3212_v55  ;;  %v2850_v21 = vcombine.low %v212_v7, %v220_v8 }
  0xb6   :  { %1927 = vmatpush1.bf16.msra.mxu0 %v2722_v13  ;;  %2000 = vmatpush1.bf16.msra.mxu1 %v2724_v14  ;;  %v2868_v13 = vcombine.low %v229_v0, %v237_v1  ;;  %v2851_v14 = vcombine.high %v212_v7, %v220_v8  ;;  %v127_v0 = vld [vmem:[#allocation5 + $0x278] sm:$0xff] }
  0xb7   :  { %1928 = vmatprep.subr.bf16.mxu0 %v2707_v15  ;;  %2001 = vmatprep.subr.bf16.mxu1 %v2709_v16  ;;  %v2853_v15 = vcombine.high %v213_v9, %v221_v11  ;;  %v196_v16 = vld [vmem:[#allocation5 + $0x4a0] sm:$0xff]  ;;  %v103_v7 = vld [vmem:[#allocation5 + $0x1b8] sm:$0xff] }
  0xb8   :  { %v2834_v29 = vcombine.low %v196_v16, %v204_v17  ;;  %v111_v8 = vld [vmem:[#allocation5 + $0x1f8] sm:$0xff] }
  0xb9   :  { %1833 = vmatmul.mubr.bf16.gmra.mxu0 %v3218_v3  ;;  %1906 = vmatmul.mubr.bf16.gmra.mxu1 %v3218_v3 }
  0xba   :  { %1929 = vmatpush1.bf16.msra.mxu0 %v2706_v22  ;;  %2002 = vmatpush1.bf16.msra.mxu1 %v2708_v23  ;;  %v2852_v22 = vcombine.low %v213_v9, %v221_v11  ;;  %v2835_v23 = vcombine.high %v196_v16, %v204_v17  ;;  %v95_v16 = vld [vmem:[#allocation5 + $0x178] sm:$0xff] }
  0xbb   :  { %1930 = vmatprep.subr.bf16.mxu0 %v2691_v24  ;;  %2003 = vmatprep.subr.bf16.mxu1 %v2693_v25  ;;  %v2837_v24 = vcombine.high %v197_v18, %v205_v20  ;;  %v180_v25 = vld [vmem:[#allocation5 + $0x420] sm:$0xff] }
  0xbc   :  { %1948 = vmatprep.mubr.bf16.mxu0 %v3190_v56  ;;  %2021 = vmatprep.mubr.bf16.mxu1 %v3190_v56  ;;  %v2901_v56 = vcombine.high %v261_v46, %v269_v47  ;;  %v2818_v39 = vcombine.low %v180_v25, %v188_v26  ;;  %v159_v46 = vld [vmem:[#allocation5 + $0x378] sm:$0xff] }
  0xbe   :  { %1931 = vmatpush1.bf16.msra.mxu0 %v2690_v31  ;;  %2004 = vmatpush1.bf16.msra.mxu1 %v2692_v32  ;;  %v2836_v31 = vcombine.low %v197_v18, %v205_v20  ;;  %v2819_v32 = vcombine.high %v180_v25, %v188_v26  ;;  %v2744_v18 = vcombine.low %v103_v7, %v111_v8 }
  0xbf   :  { %1932 = vmatprep.subr.bf16.mxu0 %v2931_v33  ;;  %2005 = vmatprep.subr.bf16.mxu1 %v2933_v34  ;;  %v2821_v33 = vcombine.high %v181_v27, %v189_v28  ;;  %v166_v34 = vld [vmem:[#allocation5 + $0x3b0] sm:$0xff] }
  0xc0   :  { %v2806_v47 = vcombine.low %v166_v34, %v174_v35 }
  0xc2   :  { %1933 = vmatpush2.bf16.msra.mxu0 %v2930_v40  ;;  %2006 = vmatpush2.bf16.msra.mxu1 %v2932_v41  ;;  %v2820_v40 = vcombine.low %v181_v27, %v189_v28  ;;  %v2807_v41 = vcombine.high %v166_v34, %v174_v35  ;;  %v54_v28 = vld [vmem:[#allocation5 + $0x30] sm:$0xff] }
  0xc3   :  { %1934 = vmatprep.subr.bf16.mxu0 %v2915_v42  ;;  %2007 = vmatprep.subr.bf16.mxu1 %v2917_v43  ;;  %v2809_v42 = vcombine.high %v167_v36, %v175_v38  ;;  %v150_v43 = vld [vmem:[#allocation5 + $0x330] sm:$0xff] }
  0xc4   :  { %v2790_v57 = vcombine.low %v150_v43, %v158_v44 }
  0xc6   :  { %1935 = vmatpush2.bf16.msra.mxu0 %v2914_v49  ;;  %2008 = vmatpush2.bf16.msra.mxu1 %v2916_v50  ;;  %v2808_v49 = vcombine.low %v167_v36, %v175_v38  ;;  %v2791_v50 = vcombine.high %v150_v43, %v158_v44  ;;  %v294_v36 = vld [vmem:[#allocation5 + $0x7b0] sm:$0xff] }
  0xc7   :  { %1936 = vmatprep.subr.bf16.mxu0 %v2899_v51  ;;  %2009 = vmatprep.subr.bf16.mxu1 %v2901_v56  ;;  %v2793_v51 = vcombine.high %v151_v45, %v159_v46  ;;  %v134_v56 = vld [vmem:[#allocation5 + $0x2b0] sm:$0xff] }
  0xc8   :  { %v2774_v1 = vcombine.low %v134_v56, %v142_v52  ;;  %v302_v38 = vld [vmem:[#allocation5 + $0x7f0] sm:$0xff] }
  0xc9   :  { %v278_v44 = vld [vmem:[#allocation5 + $0x730] sm:$0xff] }
  0xca   :  { %1937 = vmatpush2.bf16.msra.mxu0 %v2898_v58  ;;  %2010 = vmatpush2.bf16.msra.mxu1 %v2900_v59  ;;  %v2792_v58 = vcombine.low %v151_v45, %v159_v46  ;;  %v2775_v59 = vcombine.high %v134_v56, %v142_v52  ;;  %v286_v45 = vld [vmem:[#allocation5 + $0x770] sm:$0xff]  ;;  %v3085_v46 = vld [vmem:[#allocation2 + $0x4] ss:$8 sps:$4 sm:$0xff]  }
  0xcb   :  { %1938 = vmatprep.subr.bf16.mxu0 %v2883_v60  ;;  %2011 = vmatprep.subr.bf16.mxu1 %v2885_v61  ;;  %v2777_v60 = vcombine.high %v135_v53, %v143_v54  ;;  %v118_v61 = vld [vmem:[#allocation5 + $0x230] sm:$0xff]  ;;  %v2919_v56 = vcombine.high %v278_v44, %v286_v45 }
  0xcc   :  { %v2758_v9 = vcombine.low %v118_v61, %v126_v62  ;;  %v262_v52 = vld [vmem:[#allocation5 + $0x6b0] sm:$0xff] }
  0xce   :  { %1939 = vmatpush2.bf16.msra.mxu0 %v2882_v2  ;;  %2012 = vmatpush2.bf16.msra.mxu1 %v2884_v4  ;;  %v2759_v2 = vcombine.high %v118_v61, %v126_v62  ;;  %v2761_v4 = vcombine.high %v119_v63, %v127_v0  ;;  %v246_v62 = vld [vmem:[#allocation5 + $0x630] sm:$0xff] }
  0xcf   :  { %1940 = vmatprep.subr.bf16.mxu0 %v2867_v5  ;;  %2013 = vmatprep.subr.bf16.mxu1 %v2869_v6  ;;  %v102_v5 = vld [vmem:[#allocation5 + $0x1b0] sm:$0xff] }
  0xd0   :  { %v110_v6 = vld [vmem:[#allocation5 + $0x1f0] sm:$0xff] }
  0xd1   :  { %v2743_v11 = vcombine.high %v102_v5, %v110_v6  ;;  %v2742_v17 = vcombine.low %v102_v5, %v110_v6  ;;  %v230_v6 = vld [vmem:[#allocation5 + $0x5b0] sm:$0xff] }
  0xd2   :  { %1941 = vmatpush2.bf16.msra.mxu0 %v2866_v12  ;;  %2014 = vmatpush2.bf16.msra.mxu1 %v2868_v13  ;;  %v2745_v12 = vcombine.high %v103_v7, %v111_v8  ;;  %v86_v13 = vld [vmem:[#allocation5 + $0x130] sm:$0xff]  ;;  %v231_v8 = vld [vmem:[#allocation5 + $0x5b8] sm:$0xff] }
  0xd3   :  { %1942 = vmatprep.subr.bf16.mxu0 %v2851_v14  ;;  %2015 = vmatprep.subr.bf16.mxu1 %v2853_v15  ;;  %v94_v14 = vld [vmem:[#allocation5 + $0x170] sm:$0xff]  ;;  %v87_v15 = vld [vmem:[#allocation5 + $0x138] sm:$0xff] }
  0xd4   :  { %v2729_v20 = vcombine.high %v87_v15, %v95_v16  ;;  %v2726_v25 = vcombine.low %v86_v13, %v94_v14  ;;  %v238_v7 = vld [vmem:[#allocation5 + $0x5f0] sm:$0xff] }
  0xd6   :  { %1943 = vmatpush2.bf16.msra.mxu0 %v2850_v21  ;;  %2016 = vmatpush2.bf16.msra.mxu1 %v2852_v22  ;;  %v70_v21 = vld [vmem:[#allocation5 + $0xb0] sm:$0xff] }
  0xd7   :  { %1944 = vmatprep.subr.bf16.mxu0 %v2835_v23  ;;  %2017 = vmatprep.subr.bf16.mxu1 %v2837_v24  ;;  %v78_v22 = vld [vmem:[#allocation5 + $0xf0] sm:$0xff]  ;;  %v71_v23 = vld [vmem:[#allocation5 + $0xb8] sm:$0xff] }
  0xd8   :  { %v79_v24 = vld [vmem:[#allocation5 + $0xf8] sm:$0xff]  ;;  %v2711_v26 = vcombine.high %v70_v21, %v78_v22 }
  0xd9   :  { %v2713_v27 = vcombine.high %v71_v23, %v79_v24  ;;  %v2712_v34 = vcombine.low %v71_v23, %v79_v24  ;;  %v206_v23 = vld [vmem:[#allocation5 + $0x4f0] sm:$0xff]  ;;  %v199_v24 = vld [vmem:[#allocation5 + $0x4b8] sm:$0xff] }
  0xda   :  { %1945 = vmatpush2.bf16.msra.mxu0 %v2834_v29  ;;  %2018 = vmatpush2.bf16.msra.mxu1 %v2836_v31  ;;  %v62_v29 = vld [vmem:[#allocation5 + $0x70] sm:$0xff]  ;;  %v55_v31 = vld [vmem:[#allocation5 + $0x38] sm:$0xff] }
  0xdb   :  { %1946 = vmatprep.subr.bf16.mxu0 %v2819_v32  ;;  %2019 = vmatprep.subr.bf16.mxu1 %v2821_v33  ;;  %v63_v32 = vld [vmem:[#allocation5 + $0x78] sm:$0xff]  ;;  %v2710_v33 = vcombine.low %v70_v21, %v78_v22  ;;  %v198_v22 = vld [vmem:[#allocation5 + $0x4b0] sm:$0xff] }
  0xdc   :  { %v2697_v35 = vcombine.high %v55_v31, %v63_v32 }
  0xde   :  { %1947 = vmatpush2.bf16.msra.mxu0 %v2818_v39  ;;  %2020 = vmatpush2.bf16.msra.mxu1 %v2820_v40  ;;  %v295_v39 = vld [vmem:[#allocation5 + $0x7b8] sm:$0xff] }
  0xdf   :  { %2062 = vmatprep.subr.bf16.mxu0 %v2807_v41  ;;  %2135 = vmatprep.subr.bf16.mxu1 %v2809_v42  ;;  %v303_v40 = vld [vmem:[#allocation5 + $0x7f8] sm:$0xff]  ;;  %v2694_v41 = vcombine.low %v54_v28, %v62_v29  ;;  %v2935_v42 = vcombine.high %v294_v36, %v302_v38 }
  0xe0   :  { %v2937_v43 = vcombine.high %v295_v39, %v303_v40 }
  0xe1   :  { %1949 = vmatmul.mubr.bf16.vlgmr.msra.gmra.mxu0 %v3194_v10  ;;  %2022 = vmatmul.mubr.bf16.vlgmr.msra.gmra.mxu1 %v3194_v10  ;;  %v2776_v10 = vcombine.low %v135_v53, %v143_v54  ;;  %v270_v53 = vld [vmem:[#allocation5 + $0x6f0] sm:$0xff]  ;;  %v263_v54 = vld [vmem:[#allocation5 + $0x6b8] sm:$0xff] }
  0xe2   :  { %2063 = vmatpush1.bf16.msra.mxu0 %v2806_v47  ;;  %2136 = vmatpush1.bf16.msra.mxu1 %v2808_v49  ;;  %v279_v47 = vld [vmem:[#allocation5 + $0x738] sm:$0xff] }
  0xe3   :  { %2064 = vmatprep.subr.bf16.mxu0 %v2791_v50  ;;  %2137 = vmatprep.subr.bf16.mxu1 %v2793_v51  ;;  %v287_v49 = vld [vmem:[#allocation5 + $0x778] sm:$0xff]  ;;  %v2934_v50 = vcombine.low %v294_v36, %v302_v38  ;;  %v2936_v51 = vcombine.low %v295_v39, %v303_v40 }
  0xe4   :  { %1958 = vmatprep.mubr.bf16.mxu0 %v3196_v19  ;;  %2031 = vmatprep.mubr.bf16.mxu1 %v3196_v19  ;;  %v2760_v19 = vcombine.low %v119_v63, %v127_v0  ;;  %v254_v63 = vld [vmem:[#allocation5 + $0x670] sm:$0xff]  ;;  %v247_v0 = vld [vmem:[#allocation5 + $0x638] sm:$0xff] }
  0xe6   :  { %2065 = vmatpush1.bf16.msra.mxu0 %v2790_v57  ;;  %2138 = vmatpush1.bf16.msra.mxu1 %v2792_v58  ;;  %v271_v57 = vld [vmem:[#allocation5 + $0x6f8] sm:$0xff]  ;;  %v2918_v58 = vcombine.low %v278_v44, %v286_v45 }
  0xe7   :  { %2066 = vmatprep.subr.bf16.mxu0 %v2775_v59  ;;  %2139 = vmatprep.subr.bf16.mxu1 %v2777_v60  ;;  %v2920_v59 = vcombine.low %v279_v47, %v287_v49  ;;  %v2903_v60 = vcombine.high %v262_v52, %v270_v53  ;;  %v2905_v61 = vcombine.high %v263_v54, %v271_v57 }
  0xe9   :  { %1959 = vmatmul.mubr.bf16.gmra.mxu0 %v3202_v30  ;;  %2032 = vmatmul.mubr.bf16.gmra.mxu1 %v3202_v30  ;;  %v2727_v30 = vcombine.high %v86_v13, %v94_v14  ;;  %v214_v14 = vld [vmem:[#allocation5 + $0x530] sm:$0xff] }
  0xea   :  { %2067 = vmatpush1.bf16.msra.mxu0 %v2774_v1  ;;  %2140 = vmatpush1.bf16.msra.mxu1 %v2776_v10  ;;  %v255_v1 = vld [vmem:[#allocation5 + $0x678] sm:$0xff]  ;;  %v2902_v10 = vcombine.low %v262_v52, %v270_v53 }
  0xeb   :  { %2068 = vmatprep.subr.bf16.mxu0 %v2759_v2  ;;  %2141 = vmatprep.subr.bf16.mxu1 %v2761_v4  ;;  %v2904_v2 = vcombine.low %v263_v54, %v271_v57  ;;  %v2887_v4 = vcombine.high %v246_v62, %v254_v63  ;;  %v2889_v5 = vcombine.high %v247_v0, %v255_v1  ;;  %v3088_v52 = vld [vmem:[#allocation2 + $0x10] ss:$8 sps:$4 sm:$0xff]   ;;  %v3089_v54 = vld [vmem:[#allocation2 + $0x24] ss:$8 sps:$4 sm:$0xff]  }
  0xec   :  { %1968 = vmatprep.mubr.bf16.mxu0 %v3204_v37  ;;  %2041 = vmatprep.mubr.bf16.mxu1 %v3204_v37  ;;  %v2728_v37 = vcombine.low %v87_v15, %v95_v16  ;;  %v222_v15 = vld [vmem:[#allocation5 + $0x570] sm:$0xff]  ;;  %v215_v16 = vld [vmem:[#allocation5 + $0x538] sm:$0xff] }
  0xee   :  { %2069 = vmatpush1.bf16.msra.mxu0 %v2758_v9  ;;  %2142 = vmatpush1.bf16.msra.mxu1 %v2760_v19  ;;  %v239_v9 = vld [vmem:[#allocation5 + $0x5f8] sm:$0xff]  ;;  %v2886_v19 = vcombine.low %v246_v62, %v254_v63 }
  0xef   :  { %2070 = vmatprep.subr.bf16.mxu0 %v2743_v11  ;;  %2143 = vmatprep.subr.bf16.mxu1 %v2745_v12  ;;  %v2888_v11 = vcombine.low %v247_v0, %v255_v1  ;;  %v2871_v12 = vcombine.high %v230_v6, %v238_v7  ;;  %v2873_v13 = vcombine.high %v231_v8, %v239_v9 }
  0xf1   :  { %1969 = vmatmul.mubr.bf16.gmra.mxu0 %v3210_v48  ;;  %2042 = vmatmul.mubr.bf16.gmra.mxu1 %v3210_v48  ;;  %v2695_v48 = vcombine.high %v54_v28, %v62_v29  ;;  %v182_v29 = vld [vmem:[#allocation5 + $0x430] sm:$0xff] }
  0xf2   :  { %2071 = vmatpush1.bf16.msra.mxu0 %v2742_v17  ;;  %2144 = vmatpush1.bf16.msra.mxu1 %v2744_v18  ;;  %v223_v17 = vld [vmem:[#allocation5 + $0x578] sm:$0xff]  ;;  %v2870_v18 = vcombine.low %v230_v6, %v238_v7 }
  0xf3   :  { %2072 = vmatprep.subr.bf16.mxu0 %v2727_v30  ;;  %2145 = vmatprep.subr.bf16.mxu1 %v2729_v20  ;;  %v2872_v30 = vcombine.low %v231_v8, %v239_v9  ;;  %v2855_v20 = vcombine.high %v214_v14, %v222_v15  ;;  %v2857_v21 = vcombine.high %v215_v16, %v223_v17  ;;  %v3091_v6 = vld [vmem:[#allocation2 + $0x34] ss:$8 sps:$4 sm:$0xff]  }
  0xf4   :  { %1978 = vmatprep.mubr.bf16.mxu0 %v3212_v55  ;;  %2051 = vmatprep.mubr.bf16.mxu1 %v3212_v55  ;;  %v2696_v55 = vcombine.low %v55_v31, %v63_v32  ;;  %v190_v31 = vld [vmem:[#allocation5 + $0x470] sm:$0xff]  ;;  %v183_v32 = vld [vmem:[#allocation5 + $0x438] sm:$0xff] }
  0xf5   :  { %v2822_v38 = vcombine.low %v182_v29, %v190_v31 }
  0xf6   :  { %2073 = vmatpush1.bf16.msra.mxu0 %v2726_v25  ;;  %2146 = vmatpush1.bf16.msra.mxu1 %v2728_v37  ;;  %v207_v25 = vld [vmem:[#allocation5 + $0x4f8] sm:$0xff]  ;;  %v2854_v37 = vcombine.low %v214_v14, %v222_v15 }
  0xf7   :  { %2074 = vmatprep.subr.bf16.mxu0 %v2711_v26  ;;  %2147 = vmatprep.subr.bf16.mxu1 %v2713_v27  ;;  %v2856_v26 = vcombine.low %v215_v16, %v223_v17  ;;  %v2839_v27 = vcombine.high %v198_v22, %v206_v23  ;;  %v2841_v28 = vcombine.high %v199_v24, %v207_v25  ;;  %v3092_v17 = vld [vmem:[#allocation2 + $0x30] ss:$8 sps:$4 sm:$0xff]  }
  0xf9   :  { %1979 = vmatmul.mubr.bf16.gmra.mxu0 %v3218_v3  ;;  %2052 = vmatmul.mubr.bf16.gmra.mxu1 %v3218_v3  ;;  %v2921_v3 = vcombine.high %v279_v47, %v287_v49 }
  0xfa   :  { %2075 = vmatpush1.bf16.msra.mxu0 %v2710_v33  ;;  %2148 = vmatpush1.bf16.msra.mxu1 %v2712_v34  ;;  %v191_v33 = vld [vmem:[#allocation5 + $0x478] sm:$0xff]  ;;  %v2838_v34 = vcombine.low %v198_v22, %v206_v23 }
  0xfb   :  { %2076 = vmatprep.subr.bf16.mxu0 %v2695_v48  ;;  %2149 = vmatprep.subr.bf16.mxu1 %v2697_v35  ;;  %v2840_v48 = vcombine.low %v199_v24, %v207_v25  ;;  %v2823_v35 = vcombine.high %v182_v29, %v190_v31  ;;  %v2825_v36 = vcombine.high %v183_v32, %v191_v33 }
  0xfc   :  { %2094 = vmatprep.mubr.bf16.mxu0 %v3085_v46  ;;  %2167 = vmatprep.mubr.bf16.mxu1 %v3085_v46  ;;  %v2824_v39 = vcombine.low %v183_v32, %v191_v33 }
  0xfe   :  { %2077 = vmatpush1.bf16.msra.mxu0 %v2694_v41  ;;  %2150 = vmatpush1.bf16.msra.mxu1 %v2696_v55  ;;  %v3086_v41 = vld [vmem:[#allocation2] ss:$8 sps:$4 sm:$0xff]  }
  0xff   :  { %2078 = vmatprep.subr.bf16.mxu0 %v2935_v42  ;;  %2151 = vmatprep.subr.bf16.mxu1 %v2937_v43  ;;  %v3087_v42 = vld [vmem:[#allocation2 + $0x14] ss:$8 sps:$4 sm:$0xff]  }
 0x102   :  { %2079 = vmatpush2.bf16.msra.mxu0 %v2934_v50  ;;  %2152 = vmatpush2.bf16.msra.mxu1 %v2936_v51 }
 0x103   :  { %2080 = vmatprep.subr.bf16.mxu0 %v2919_v56  ;;  %2153 = vmatprep.subr.bf16.mxu1 %v2921_v3 }
 0x106   :  { %2081 = vmatpush2.bf16.msra.mxu0 %v2918_v58  ;;  %2154 = vmatpush2.bf16.msra.mxu1 %v2920_v59 }
 0x107   :  { %2082 = vmatprep.subr.bf16.mxu0 %v2903_v60  ;;  %2155 = vmatprep.subr.bf16.mxu1 %v2905_v61 }
 0x10a   :  { %2083 = vmatpush2.bf16.msra.mxu0 %v2902_v10  ;;  %2156 = vmatpush2.bf16.msra.mxu1 %v2904_v2  ;;  %v3090_v2 = vld [vmem:[#allocation2 + $0x20] ss:$8 sps:$4 sm:$0xff]  }
 0x10b   :  { %2084 = vmatprep.subr.bf16.mxu0 %v2887_v4  ;;  %2157 = vmatprep.subr.bf16.mxu1 %v2889_v5 }
 0x10e   :  { %2085 = vmatpush2.bf16.msra.mxu0 %v2886_v19  ;;  %2158 = vmatpush2.bf16.msra.mxu1 %v2888_v11 }
 0x10f   :  { %2086 = vmatprep.subr.bf16.mxu0 %v2871_v12  ;;  %2159 = vmatprep.subr.bf16.mxu1 %v2873_v13 }
 0x112   :  { %2087 = vmatpush2.bf16.msra.mxu0 %v2870_v18  ;;  %2160 = vmatpush2.bf16.msra.mxu1 %v2872_v30 }
 0x113   :  { %2088 = vmatprep.subr.bf16.mxu0 %v2855_v20  ;;  %2161 = vmatprep.subr.bf16.mxu1 %v2857_v21 }
 0x116   :  { %2089 = vmatpush2.bf16.msra.mxu0 %v2854_v37  ;;  %2162 = vmatpush2.bf16.msra.mxu1 %v2856_v26 }
 0x117   :  { %2090 = vmatprep.subr.bf16.mxu0 %v2839_v27  ;;  %2163 = vmatprep.subr.bf16.mxu1 %v2841_v28 }
 0x11a   :  { %2091 = vmatpush2.bf16.msra.mxu0 %v2838_v34  ;;  %2164 = vmatpush2.bf16.msra.mxu1 %v2840_v48 }
 0x11b   :  { %2092 = vmatprep.subr.bf16.mxu0 %v2823_v35  ;;  %2165 = vmatprep.subr.bf16.mxu1 %v2825_v36 }
 0x11e   :  { %2093 = vmatpush2.bf16.msra.mxu0 %v2822_v38  ;;  %2166 = vmatpush2.bf16.msra.mxu1 %v2824_v39 }
 0x121   :  { %v1658_v40 = vpop.f32.mrf.mxu0  ;;  %2095 = vmatmul.mubr.bf16.vlgmr.msra.gmra.mxu0 %v3086_v41  ;;  %v1731_v55 = vpop.f32.mrf.mxu1  ;;  %2168 = vmatmul.mubr.bf16.vlgmr.msra.gmra.mxu1 %v3086_v41 }
 0x122   :  { %2104 = vmatprep.mubr.bf16.mxu0 %v3087_v42  ;;  %2177 = vmatprep.mubr.bf16.mxu1 %v3087_v42 }
 0x123   :  { %v1660_v43 = vpop.f32.mrf.mxu0  ;;  %v1733_v45 = vpop.f32.mrf.mxu1 }
 0x124   :  { %v3002_v44 = vpack.c.bf16 %v1660_v43, %v1658_v40  ;;  %v3003_v46 = vpack.c.bf16 %v1733_v45, %v1731_v55 }
 0x125   :  { %v1662_v47 = vpop.f32.mrf.mxu0  ;;  %v1735_v49 = vpop.f32.mrf.mxu1 }
 0x126   :  { %2592 = vst [vmem:[#allocation7] sm:$0xff] %v3002_v44  ;;  %2593 = vst [vmem:[#allocation7 + $0x8] sm:$0xff] %v3003_v46 }
 0x127   :  { %v1664_v50 = vpop.f32.mrf.mxu0  ;;  %v1737_v56 = vpop.f32.mrf.mxu1 }
 0x128   :  { %v3010_v51 = vpack.c.bf16 %v1664_v50, %v1662_v47  ;;  %v3011_v3 = vpack.c.bf16 %v1737_v56, %v1735_v49 }
 0x129   :  { %2105 = vmatmul.mubr.bf16.gmra.mxu0 %v3088_v52  ;;  %v1668_v53 = vpop.f32.mrf.mxu0  ;;  %2178 = vmatmul.mubr.bf16.gmra.mxu1 %v3088_v52  ;;  %v1741_v57 = vpop.f32.mrf.mxu1 }
 0x12a   :  { %2600 = vst [vmem:[#allocation7 + $0x40] sm:$0xff] %v3010_v51  ;;  %2114 = vmatprep.mubr.bf16.mxu0 %v3089_v54  ;;  %2601 = vst [vmem:[#allocation7 + $0x48] sm:$0xff] %v3011_v3  ;;  %2187 = vmatprep.mubr.bf16.mxu1 %v3089_v54 }
 0x12b   :  { %v1670_v58 = vpop.f32.mrf.mxu0  ;;  %v1743_v60 = vpop.f32.mrf.mxu1 }
 0x12c   :  { %v3018_v59 = vpack.c.bf16 %v1670_v58, %v1668_v53  ;;  %v3019_v61 = vpack.c.bf16 %v1743_v60, %v1741_v57 }
 0x12d   :  { %v1672_v62 = vpop.f32.mrf.mxu0  ;;  %v1745_v63 = vpop.f32.mrf.mxu1 }
 0x12e   :  { %2608 = vst [vmem:[#allocation7 + $0x80] sm:$0xff] %v3018_v59  ;;  %2609 = vst [vmem:[#allocation7 + $0x88] sm:$0xff] %v3019_v61 }
 0x12f   :  { %v1674_v0 = vpop.f32.mrf.mxu0  ;;  %v1747_v10 = vpop.f32.mrf.mxu1 }
 0x130   :  { %v3026_v1 = vpack.c.bf16 %v1674_v0, %v1672_v62  ;;  %v3027_v4 = vpack.c.bf16 %v1747_v10, %v1745_v63 }
 0x131   :  { %2115 = vmatmul.mubr.bf16.gmra.mxu0 %v3090_v2  ;;  %v1678_v5 = vpop.f32.mrf.mxu0  ;;  %2188 = vmatmul.mubr.bf16.gmra.mxu1 %v3090_v2  ;;  %v1751_v7 = vpop.f32.mrf.mxu1 }
 0x132   :  { %2124 = vmatprep.mubr.bf16.mxu0 %v3091_v6  ;;  %2616 = vst [vmem:[#allocation7 + $0xc0] sm:$0xff] %v3026_v1  ;;  %2197 = vmatprep.mubr.bf16.mxu1 %v3091_v6  ;;  %2617 = vst [vmem:[#allocation7 + $0xc8] sm:$0xff] %v3027_v4 }
 0x133   :  { %v1680_v8 = vpop.f32.mrf.mxu0  ;;  %v1753_v19 = vpop.f32.mrf.mxu1 }
 0x134   :  { %v3034_v9 = vpack.c.bf16 %v1680_v8, %v1678_v5  ;;  %v3035_v11 = vpack.c.bf16 %v1753_v19, %v1751_v7 }
 0x135   :  { %v1682_v12 = vpop.f32.mrf.mxu0  ;;  %v1755_v13 = vpop.f32.mrf.mxu1 }
 0x136   :  { %2624 = vst [vmem:[#allocation7 + $0x100] sm:$0xff] %v3034_v9  ;;  %2625 = vst [vmem:[#allocation7 + $0x108] sm:$0xff] %v3035_v11 }
 0x137   :  { %v1684_v14 = vpop.f32.mrf.mxu0  ;;  %v1757_v16 = vpop.f32.mrf.mxu1 }
 0x138   :  { %v3042_v15 = vpack.c.bf16 %v1684_v14, %v1682_v12  ;;  %v3043_v18 = vpack.c.bf16 %v1757_v16, %v1755_v13 }
 0x139   :  { %2125 = vmatmul.mubr.bf16.gmra.mxu0 %v3092_v17  ;;  %v1688_v30 = vpop.f32.mrf.mxu0  ;;  %2198 = vmatmul.mubr.bf16.gmra.mxu1 %v3092_v17  ;;  %v1761_v20 = vpop.f32.mrf.mxu1 }
 0x13a   :  { %2632 = vst [vmem:[#allocation7 + $0x140] sm:$0xff] %v3042_v15  ;;  %2633 = vst [vmem:[#allocation7 + $0x148] sm:$0xff] %v3043_v18 }
 0x13b   :  { %v1690_v21 = vpop.f32.mrf.mxu0  ;;  %v1763_v23 = vpop.f32.mrf.mxu1 }
 0x13c   :  { %v3050_v22 = vpack.c.bf16 %v1690_v21, %v1688_v30  ;;  %v3051_v24 = vpack.c.bf16 %v1763_v23, %v1761_v20 }
 0x13d   :  { %v1692_v25 = vpop.f32.mrf.mxu0  ;;  %v1765_v37 = vpop.f32.mrf.mxu1 }
 0x13e   :  { %2640 = vst [vmem:[#allocation7 + $0x180] sm:$0xff] %v3050_v22  ;;  %2641 = vst [vmem:[#allocation7 + $0x188] sm:$0xff] %v3051_v24 }
 0x13f   :  { %v1694_v26 = vpop.f32.mrf.mxu0  ;;  %v1767_v28 = vpop.f32.mrf.mxu1 }
 0x140   :  { %v3058_v27 = vpack.c.bf16 %v1694_v26, %v1692_v25  ;;  %v3059_v29 = vpack.c.bf16 %v1767_v28, %v1765_v37 }
 0x142   :  { %2648 = vst [vmem:[#allocation7 + $0x1c0] sm:$0xff] %v3058_v27  ;;  %2649 = vst [vmem:[#allocation7 + $0x1c8] sm:$0xff] %v3059_v29 }
 0x161   :  { %v1804_v31 = vpop.f32.mrf.mxu0  ;;  %v1877_v32 = vpop.f32.mrf.mxu1 }
 0x163   :  { %v1806_v33 = vpop.f32.mrf.mxu0  ;;  %v1879_v48 = vpop.f32.mrf.mxu1 }
 0x164   :  { %v3004_v34 = vpack.c.bf16 %v1806_v33, %v1804_v31  ;;  %v3005_v35 = vpack.c.bf16 %v1879_v48, %v1877_v32 }
 0x165   :  { %v1808_v36 = vpop.f32.mrf.mxu0  ;;  %v1881_v38 = vpop.f32.mrf.mxu1 }
 0x166   :  { %2594 = vst [vmem:[#allocation7 + $0x10] sm:$0xff] %v3004_v34  ;;  %2595 = vst [vmem:[#allocation7 + $0x18] sm:$0xff] %v3005_v35 }
 0x167   :  { %v1810_v39 = vpop.f32.mrf.mxu0  ;;  %v1883_v41 = vpop.f32.mrf.mxu1 }
 0x168   :  { %v3012_v40 = vpack.c.bf16 %v1810_v39, %v1808_v36  ;;  %v3013_v55 = vpack.c.bf16 %v1883_v41, %v1881_v38 }
 0x169   :  { %v1814_v42 = vpop.f32.mrf.mxu0  ;;  %v1887_v43 = vpop.f32.mrf.mxu1 }
 0x16a   :  { %2602 = vst [vmem:[#allocation7 + $0x50] sm:$0xff] %v3012_v40  ;;  %2603 = vst [vmem:[#allocation7 + $0x58] sm:$0xff] %v3013_v55 }
 0x16b   :  { %v1816_v44 = vpop.f32.mrf.mxu0  ;;  %v1889_v46 = vpop.f32.mrf.mxu1 }
 0x16c   :  { %v3020_v45 = vpack.c.bf16 %v1816_v44, %v1814_v42  ;;  %v3021_v47 = vpack.c.bf16 %v1889_v46, %v1887_v43 }
 0x16d   :  { %v1818_v49 = vpop.f32.mrf.mxu0  ;;  %v1891_v50 = vpop.f32.mrf.mxu1 }
 0x16e   :  { %2610 = vst [vmem:[#allocation7 + $0x90] sm:$0xff] %v3020_v45  ;;  %2611 = vst [vmem:[#allocation7 + $0x98] sm:$0xff] %v3021_v47 }
 0x16f   :  { %v1820_v51 = vpop.f32.mrf.mxu0  ;;  %v1893_v3 = vpop.f32.mrf.mxu1 }
 0x170   :  { %v3028_v56 = vpack.c.bf16 %v1820_v51, %v1818_v49  ;;  %v3029_v52 = vpack.c.bf16 %v1893_v3, %v1891_v50 }
 0x171   :  { %v1824_v53 = vpop.f32.mrf.mxu0  ;;  %v1897_v54 = vpop.f32.mrf.mxu1 }
 0x172   :  { %2618 = vst [vmem:[#allocation7 + $0xd0] sm:$0xff] %v3028_v56  ;;  %2619 = vst [vmem:[#allocation7 + $0xd8] sm:$0xff] %v3029_v52 }
 0x173   :  { %v1826_v57 = vpop.f32.mrf.mxu0  ;;  %v1899_v59 = vpop.f32.mrf.mxu1 }
 0x174   :  { %v3036_v58 = vpack.c.bf16 %v1826_v57, %v1824_v53  ;;  %v3037_v60 = vpack.c.bf16 %v1899_v59, %v1897_v54 }
 0x175   :  { %v1828_v61 = vpop.f32.mrf.mxu0  ;;  %v1901_v62 = vpop.f32.mrf.mxu1 }
 0x176   :  { %2626 = vst [vmem:[#allocation7 + $0x110] sm:$0xff] %v3036_v58  ;;  %2627 = vst [vmem:[#allocation7 + $0x118] sm:$0xff] %v3037_v60 }
 0x177   :  { %v1830_v63 = vpop.f32.mrf.mxu0  ;;  %v1903_v1 = vpop.f32.mrf.mxu1 }
 0x178   :  { %v3044_v0 = vpack.c.bf16 %v1830_v63, %v1828_v61  ;;  %v3045_v10 = vpack.c.bf16 %v1903_v1, %v1901_v62 }
 0x179   :  { %v1834_v2 = vpop.f32.mrf.mxu0  ;;  %v1907_v4 = vpop.f32.mrf.mxu1 }
 0x17a   :  { %2634 = vst [vmem:[#allocation7 + $0x150] sm:$0xff] %v3044_v0  ;;  %2635 = vst [vmem:[#allocation7 + $0x158] sm:$0xff] %v3045_v10 }
 0x17b   :  { %v1836_v5 = vpop.f32.mrf.mxu0  ;;  %v1909_v7 = vpop.f32.mrf.mxu1 }
 0x17c   :  { %v3052_v6 = vpack.c.bf16 %v1836_v5, %v1834_v2  ;;  %v3053_v8 = vpack.c.bf16 %v1909_v7, %v1907_v4 }
 0x17d   :  { %v1838_v9 = vpop.f32.mrf.mxu0  ;;  %v1911_v19 = vpop.f32.mrf.mxu1 }
 0x17e   :  { %2642 = vst [vmem:[#allocation7 + $0x190] sm:$0xff] %v3052_v6  ;;  %2643 = vst [vmem:[#allocation7 + $0x198] sm:$0xff] %v3053_v8 }
 0x17f   :  { %v1840_v11 = vpop.f32.mrf.mxu0  ;;  %v1913_v13 = vpop.f32.mrf.mxu1 }
 0x180   :  { %v3060_v12 = vpack.c.bf16 %v1840_v11, %v1838_v9  ;;  %v3061_v14 = vpack.c.bf16 %v1913_v13, %v1911_v19 }
 0x182   :  { %2650 = vst [vmem:[#allocation7 + $0x1d0] sm:$0xff] %v3060_v12  ;;  %2651 = vst [vmem:[#allocation7 + $0x1d8] sm:$0xff] %v3061_v14 }
 0x1a1   :  { %v1950_v15 = vpop.f32.mrf.mxu0  ;;  %v2023_v16 = vpop.f32.mrf.mxu1 }
 0x1a3   :  { %v1952_v17 = vpop.f32.mrf.mxu0  ;;  %v2025_v30 = vpop.f32.mrf.mxu1 }
 0x1a4   :  { %v3006_v18 = vpack.c.bf16 %v1952_v17, %v1950_v15  ;;  %v3007_v20 = vpack.c.bf16 %v2025_v30, %v2023_v16 }
 0x1a5   :  { %v1954_v21 = vpop.f32.mrf.mxu0  ;;  %v2027_v22 = vpop.f32.mrf.mxu1 }
 0x1a6   :  { %2596 = vst [vmem:[#allocation7 + $0x20] sm:$0xff] %v3006_v18  ;;  %2597 = vst [vmem:[#allocation7 + $0x28] sm:$0xff] %v3007_v20 }
 0x1a7   :  { %v1956_v23 = vpop.f32.mrf.mxu0  ;;  %v2029_v25 = vpop.f32.mrf.mxu1 }
 0x1a8   :  { %v3014_v24 = vpack.c.bf16 %v1956_v23, %v1954_v21  ;;  %v3015_v37 = vpack.c.bf16 %v2029_v25, %v2027_v22 }
 0x1a9   :  { %v1960_v26 = vpop.f32.mrf.mxu0  ;;  %v2033_v27 = vpop.f32.mrf.mxu1 }
 0x1aa   :  { %2604 = vst [vmem:[#allocation7 + $0x60] sm:$0xff] %v3014_v24  ;;  %2605 = vst [vmem:[#allocation7 + $0x68] sm:$0xff] %v3015_v37 }
 0x1ab   :  { %v1962_v28 = vpop.f32.mrf.mxu0  ;;  %v2035_v31 = vpop.f32.mrf.mxu1 }
 0x1ac   :  { %v3022_v29 = vpack.c.bf16 %v1962_v28, %v1960_v26  ;;  %v3023_v32 = vpack.c.bf16 %v2035_v31, %v2033_v27 }
 0x1ad   :  { %v1964_v33 = vpop.f32.mrf.mxu0  ;;  %v2037_v34 = vpop.f32.mrf.mxu1 }
 0x1ae   :  { %2612 = vst [vmem:[#allocation7 + $0xa0] sm:$0xff] %v3022_v29  ;;  %2613 = vst [vmem:[#allocation7 + $0xa8] sm:$0xff] %v3023_v32 }
 0x1af   :  { %v1966_v48 = vpop.f32.mrf.mxu0  ;;  %v2039_v36 = vpop.f32.mrf.mxu1 }
 0x1b0   :  { %v3030_v35 = vpack.c.bf16 %v1966_v48, %v1964_v33  ;;  %v3031_v38 = vpack.c.bf16 %v2039_v36, %v2037_v34 }
 0x1b1   :  { %v1970_v39 = vpop.f32.mrf.mxu0  ;;  %v2043_v40 = vpop.f32.mrf.mxu1 }
 0x1b2   :  { %2620 = vst [vmem:[#allocation7 + $0xe0] sm:$0xff] %v3030_v35  ;;  %2621 = vst [vmem:[#allocation7 + $0xe8] sm:$0xff] %v3031_v38 }
 0x1b3   :  { %v1972_v41 = vpop.f32.mrf.mxu0  ;;  %v2045_v42 = vpop.f32.mrf.mxu1 }
 0x1b4   :  { %v3038_v55 = vpack.c.bf16 %v1972_v41, %v1970_v39  ;;  %v3039_v43 = vpack.c.bf16 %v2045_v42, %v2043_v40 }
 0x1b5   :  { %v1974_v44 = vpop.f32.mrf.mxu0  ;;  %v2047_v45 = vpop.f32.mrf.mxu1 }
 0x1b6   :  { %2628 = vst [vmem:[#allocation7 + $0x120] sm:$0xff] %v3038_v55  ;;  %2629 = vst [vmem:[#allocation7 + $0x128] sm:$0xff] %v3039_v43 }
 0x1b7   :  { %v1976_v46 = vpop.f32.mrf.mxu0  ;;  %v2049_v49 = vpop.f32.mrf.mxu1 }
 0x1b8   :  { %v3046_v47 = vpack.c.bf16 %v1976_v46, %v1974_v44  ;;  %v3047_v50 = vpack.c.bf16 %v2049_v49, %v2047_v45 }
 0x1b9   :  { %v1980_v51 = vpop.f32.mrf.mxu0  ;;  %v2053_v56 = vpop.f32.mrf.mxu1 }
 0x1ba   :  { %2636 = vst [vmem:[#allocation7 + $0x160] sm:$0xff] %v3046_v47  ;;  %2637 = vst [vmem:[#allocation7 + $0x168] sm:$0xff] %v3047_v50 }
 0x1bb   :  { %v1982_v3 = vpop.f32.mrf.mxu0  ;;  %v2055_v53 = vpop.f32.mrf.mxu1 }
 0x1bc   :  { %v3054_v52 = vpack.c.bf16 %v1982_v3, %v1980_v51  ;;  %v3055_v54 = vpack.c.bf16 %v2055_v53, %v2053_v56 }
 0x1bd   :  { %v1984_v57 = vpop.f32.mrf.mxu0  ;;  %v2057_v58 = vpop.f32.mrf.mxu1 }
 0x1be   :  { %2644 = vst [vmem:[#allocation7 + $0x1a0] sm:$0xff] %v3054_v52  ;;  %2645 = vst [vmem:[#allocation7 + $0x1a8] sm:$0xff] %v3055_v54 }
 0x1bf   :  { %v1986_v59 = vpop.f32.mrf.mxu0  ;;  %v2059_v61 = vpop.f32.mrf.mxu1 }
 0x1c0   :  { %v3062_v60 = vpack.c.bf16 %v1986_v59, %v1984_v57  ;;  %v3063_v62 = vpack.c.bf16 %v2059_v61, %v2057_v58 }
 0x1c2   :  { %2652 = vst [vmem:[#allocation7 + $0x1e0] sm:$0xff] %v3062_v60  ;;  %2653 = vst [vmem:[#allocation7 + $0x1e8] sm:$0xff] %v3063_v62 }
 0x1e1   :  { %v2096_v63 = vpop.f32.mrf.mxu0  ;;  %v2169_v0 = vpop.f32.mrf.mxu1 }
 0x1e3   :  { %v2098_v1 = vpop.f32.mrf.mxu0  ;;  %v2171_v2 = vpop.f32.mrf.mxu1 }
 0x1e4   :  { %v3008_v10 = vpack.c.bf16 %v2098_v1, %v2096_v63  ;;  %v3009_v4 = vpack.c.bf16 %v2171_v2, %v2169_v0 }
 0x1e5   :  { %v2100_v5 = vpop.f32.mrf.mxu0  ;;  %v2173_v6 = vpop.f32.mrf.mxu1 }
 0x1e6   :  { %2598 = vst [vmem:[#allocation7 + $0x30] sm:$0xff] %v3008_v10  ;;  %2599 = vst [vmem:[#allocation7 + $0x38] sm:$0xff] %v3009_v4 }
 0x1e7   :  { %v2102_v7 = vpop.f32.mrf.mxu0  ;;  %v2175_v9 = vpop.f32.mrf.mxu1 }
 0x1e8   :  { %v3016_v8 = vpack.c.bf16 %v2102_v7, %v2100_v5  ;;  %v3017_v19 = vpack.c.bf16 %v2175_v9, %v2173_v6 }
 0x1e9   :  { %v2106_v11 = vpop.f32.mrf.mxu0  ;;  %v2179_v12 = vpop.f32.mrf.mxu1 }
 0x1ea   :  { %2606 = vst [vmem:[#allocation7 + $0x70] sm:$0xff] %v3016_v8  ;;  %2607 = vst [vmem:[#allocation7 + $0x78] sm:$0xff] %v3017_v19 }
 0x1eb   :  { %v2108_v13 = vpop.f32.mrf.mxu0  ;;  %v2181_v15 = vpop.f32.mrf.mxu1 }
 0x1ec   :  { %v3024_v14 = vpack.c.bf16 %v2108_v13, %v2106_v11  ;;  %v3025_v16 = vpack.c.bf16 %v2181_v15, %v2179_v12 }
 0x1ed   :  { %v2110_v17 = vpop.f32.mrf.mxu0  ;;  %v2183_v18 = vpop.f32.mrf.mxu1 }
 0x1ee   :  { %2614 = vst [vmem:[#allocation7 + $0xb0] sm:$0xff] %v3024_v14  ;;  %2615 = vst [vmem:[#allocation7 + $0xb8] sm:$0xff] %v3025_v16 }
 0x1ef   :  { %v2112_v30 = vpop.f32.mrf.mxu0  ;;  %v2185_v21 = vpop.f32.mrf.mxu1 }
 0x1f0   :  { %v3032_v20 = vpack.c.bf16 %v2112_v30, %v2110_v17  ;;  %v3033_v22 = vpack.c.bf16 %v2185_v21, %v2183_v18 }
 0x1f1   :  { %v2116_v23 = vpop.f32.mrf.mxu0  ;;  %v2189_v24 = vpop.f32.mrf.mxu1 }
 0x1f2   :  { %2622 = vst [vmem:[#allocation7 + $0xf0] sm:$0xff] %v3032_v20  ;;  %2623 = vst [vmem:[#allocation7 + $0xf8] sm:$0xff] %v3033_v22 }
 0x1f3   :  { %v2118_v25 = vpop.f32.mrf.mxu0  ;;  %v2191_v26 = vpop.f32.mrf.mxu1 }
 0x1f4   :  { %v3040_v37 = vpack.c.bf16 %v2118_v25, %v2116_v23  ;;  %v3041_v27 = vpack.c.bf16 %v2191_v26, %v2189_v24 }
 0x1f5   :  { %v2120_v28 = vpop.f32.mrf.mxu0  ;;  %v2193_v29 = vpop.f32.mrf.mxu1 }
 0x1f6   :  { %2630 = vst [vmem:[#allocation7 + $0x130] sm:$0xff] %v3040_v37  ;;  %2631 = vst [vmem:[#allocation7 + $0x138] sm:$0xff] %v3041_v27 }
 0x1f7   :  { %v2122_v31 = vpop.f32.mrf.mxu0  ;;  %v2195_v33 = vpop.f32.mrf.mxu1 }
 0x1f8   :  { %v3048_v32 = vpack.c.bf16 %v2122_v31, %v2120_v28  ;;  %v3049_v34 = vpack.c.bf16 %v2195_v33, %v2193_v29 }
 0x1f9   :  { %v2126_v48 = vpop.f32.mrf.mxu0  ;;  %v2199_v35 = vpop.f32.mrf.mxu1 }
 0x1fa   :  { %2638 = vst [vmem:[#allocation7 + $0x170] sm:$0xff] %v3048_v32  ;;  %2639 = vst [vmem:[#allocation7 + $0x178] sm:$0xff] %v3049_v34 }
 0x1fb   :  { %v2128_v36 = vpop.f32.mrf.mxu0  ;;  %v2201_v39 = vpop.f32.mrf.mxu1 }
 0x1fc   :  { %v3056_v38 = vpack.c.bf16 %v2128_v36, %v2126_v48  ;;  %v3057_v40 = vpack.c.bf16 %v2201_v39, %v2199_v35 }
 0x1fd   :  { %v2130_v41 = vpop.f32.mrf.mxu0  ;;  %v2203_v55 = vpop.f32.mrf.mxu1 }
 0x1fe   :  { %2646 = vst [vmem:[#allocation7 + $0x1b0] sm:$0xff] %v3056_v38  ;;  %2647 = vst [vmem:[#allocation7 + $0x1b8] sm:$0xff] %v3057_v40 }
 0x1ff   :  { %v2132_v42 = vpop.f32.mrf.mxu0  ;;  %v2205_v44 = vpop.f32.mrf.mxu1 }
 0x200   :  { %v3064_v43 = vpack.c.bf16 %v2132_v42, %v2130_v41  ;;  %v3065_v45 = vpack.c.bf16 %v2205_v44, %v2203_v55 }
 0x202   :  { %2654 = vst [vmem:[#allocation7 + $0x1f0] sm:$0xff] %v3064_v43  ;;  %2655 = vst [vmem:[#allocation7 + $0x1f8] sm:$0xff] %v3065_v45 }
 0x203   :  { %3144 = shalt.err (!%p3141_p0)
}
 0x204   :  { %2667 = dma.vmem_to_hbm [thread:$0]  %s2662_s1, 8192, %s3262_s2, [#allocation4], %s3163_s19, %s3163_s19, %s3164_s20  }
 0x205   :  { %3157 = dma.done.wait [#allocation4], 8192  }
 0x206   :  { %3158 = vsyncadd [#allocation4], 4294959104 }
 0x207   :  { %2671 = vsyncpa [#allocation3], 1 }
 0x208   :  { %2672 = vsyncpa [#allocation6], 1 }
 0x209   :  { %2673 = vsyncpa [#allocation4], 1 }

</bundles_post_ra>
